<compile_context>
chip_gen: v6e
topology: v6e:2x2x1
jax: 0.10.0
libtpu: 0.0.40
codegen_flags: <defaults>
</compile_context>

<pallas_src>
import jax
import jax.numpy as jnp
import numpy as np
from jax import lax
from jax.experimental import pallas as pl
from jax.experimental.pallas import tpu as pltpu


# ------------------------------- fused Pallas kernel -------------------------------

def _slimconv_kernel(x_ref,
                     w_fc1_ref, s_fc_ref, b_fc_ref,
                     w_fc2_ref, b_fc2_ref, w_fc2f_ref, b_fc2f_ref,
                     w21_ref, s21_ref, b21_ref,
                     w22a_ref, s22a_ref, b22a_ref,
                     w22b_ref, s22b_ref, b22b_ref,
                     o_ref,
                     ft_pad, t_pad):
    # x_ref: (H, W, C) f32 (batch dim squeezed by BlockSpec)
    # o_ref: (H, W, C//2 + C//4) f32
    # ft_pad: VMEM (H+2, W+2, C//2) f32 scratch (zero halo for conv2_1)
    # t_pad : VMEM (H+2, W+2, C//4) f32 scratch (zero halo for conv2_2's 3x3)
    H, W, C = x_ref.shape
    C2, C4 = C // 2, C // 4
    HW = H * W
    hp = jax.lax.Precision.HIGHEST

    x = x_ref[...]                                                     # (H, W, C) f32

    # ---- squeeze-excite gate: GAP -> 1x1 -> BN -> ReLU -> 1x1(+bias) -> sigmoid ----
    xm = jnp.mean(x.reshape(HW, C), axis=0, keepdims=True)             # (1, C)
    h = jnp.dot(xm, w_fc1_ref[...],
                preferred_element_type=jnp.float32, precision=hp)      # (1, Cmid)
    h = jnp.maximum(h * s_fc_ref[...] + b_fc_ref[...], 0.0)
    gate = jax.nn.sigmoid(
        jnp.dot(h, w_fc2_ref[...], preferred_element_type=jnp.float32,
                precision=hp) + b_fc2_ref[...])                        # (1, C)
    gate_f = jax.nn.sigmoid(
        jnp.dot(h, w_fc2f_ref[...], preferred_element_type=jnp.float32,
                precision=hp) + b_fc2f_ref[...])                       # (1, C) == flip(gate)

    # ---- channel reweight + fold: ft = w[:C/2]*x[:C/2] + w[C/2:]*x[C/2:] ----
    x1, x2 = x[:, :, :C2], x[:, :, C2:]
    g1 = gate[:, :C2].reshape(1, 1, C2)
    g2 = gate[:, C2:].reshape(1, 1, C2)
    gf1 = gate_f[:, :C2].reshape(1, 1, C2)
    gf2 = gate_f[:, C2:].reshape(1, 1, C2)
    ft1 = g1 * x1 + g2 * x2                                            # (H, W, C2) f32
    ft2 = gf1 * x1 + gf2 * x2                                          # (H, W, C2) f32

    # ---- conv2_1: 3x3 grouped conv (block-diag im2col, one deep dot) + BN ----
    ft_pad[...] = jnp.zeros_like(ft_pad)                               # zero halo
    ft_pad[1:H + 1, 1:W + 1, :] = ft1
    cols1 = jnp.concatenate(
        [ft_pad[ky:ky + H, kx:kx + W, :].reshape(HW, C2)
         for ky in range(3) for kx in range(3)], axis=1)               # (HW, 9*C2)
    y21 = jnp.dot(cols1.astype(jnp.bfloat16), w21_ref[...],
                  preferred_element_type=jnp.float32)                  # (HW, C2)
    y21 = y21 * s21_ref[...] + b21_ref[...]

    # ---- conv2_2: 1x1 + BN + ReLU -> 3x3 grouped conv + BN (t never leaves VMEM) ----
    t = jnp.dot(ft2.reshape(HW, C2).astype(jnp.bfloat16), w22a_ref[...],
                preferred_element_type=jnp.float32)                    # (HW, C4)
    t = jnp.maximum(t * s22a_ref[...] + b22a_ref[...], 0.0)
    t_pad[...] = jnp.zeros_like(t_pad)                                 # zero halo
    t_pad[1:H + 1, 1:W + 1, :] = t.reshape(H, W, C4)
    cols2 = jnp.concatenate(
        [t_pad[ky:ky + H, kx:kx + W, :].reshape(HW, C4)
         for ky in range(3) for kx in range(3)], axis=1)               # (HW, 9*C4)
    y22 = jnp.dot(cols2.astype(jnp.bfloat16), w22b_ref[...],
                  preferred_element_type=jnp.float32)                  # (HW, C4)
    y22 = y22 * s22b_ref[...] + b22b_ref[...]

    # ---- channel concat (out2_1 first) + single store ----
    out = jnp.concatenate([y21, y22], axis=1)                          # (HW, C2+C4)
    o_ref[...] = out.reshape(H, W, C2 + C4).astype(o_ref.dtype)


# ------------------------------- pallas_call wrapper -------------------------------

def slimconv_pallas_nhwc(x, kp):
    B, H, W, C = x.shape
    C2, C4 = C // 2, C // 4
    Cmid = kp["w_fc1"].shape[1]

    def bspec(shape):
        zeros = (0,) * len(shape)
        return pl.BlockSpec(shape, lambda b, _z=zeros: _z)

    return pl.pallas_call(
        _slimconv_kernel,
        out_shape=jax.ShapeDtypeStruct((B, H, W, C2 + C4), x.dtype),
        grid=(B,),
        in_specs=[
            pl.BlockSpec((None, H, W, C), lambda b: (b, 0, 0, 0)),
            bspec((C, Cmid)), bspec((1, Cmid)), bspec((1, Cmid)),
            bspec((Cmid, C)), bspec((1, C)),
            bspec((Cmid, C)), bspec((1, C)),
            bspec((9 * C2, C2)), bspec((1, C2)), bspec((1, C2)),
            bspec((C2, C4)), bspec((1, C4)), bspec((1, C4)),
            bspec((9 * C4, C4)), bspec((1, C4)), bspec((1, C4)),
        ],
        out_specs=pl.BlockSpec((None, H, W, C2 + C4), lambda b: (b, 0, 0, 0)),
        scratch_shapes=[
            pltpu.VMEM((H + 2, W + 2, C2), jnp.float32),
            pltpu.VMEM((H + 2, W + 2, C4), jnp.float32),
        ],
        compiler_params=pltpu.CompilerParams(dimension_semantics=("parallel",)),
    )(x, kp["w_fc1"], kp["s_fc"], kp["b_fc"],
      kp["w_fc2"], kp["b_fc2"], kp["w_fc2f"], kp["b_fc2f"],
      kp["w21"], kp["s21"], kp["b21"],
      kp["w22a"], kp["s22a"], kp["b22a"],
      kp["w22b"], kp["s22b"], kp["b22b"])


def slimconv_forward(x_nchw, kp):
    x = jnp.transpose(x_nchw, (0, 2, 3, 1)).astype(jnp.float32)        # NHWC
    out = slimconv_pallas_nhwc(x, kp)
    return jnp.transpose(out, (0, 3, 1, 2))                            # back to NCHW


# ------------------------------- deterministic parameters -------------------------------

def make_params(C):
    assert C % 32 == 0, "in_planes must be a multiple of 32 (fc reduce + grouped splits)"
    Cmid, C2, C4, C8 = C // 32, C // 2, C // 4, C // 8
    ks = jax.random.split(jax.random.PRNGKey(42), 10)

    def nrm(k, shape, scale=0.2):
        return scale * jax.random.normal(k, shape, jnp.float32)

    def bn(k, n, eps=1e-5):
        kg, kb, km, kv = jax.random.split(k, 4)
        gamma = 1.0 + 0.1 * jax.random.normal(kg, (n,), jnp.float32)
        beta = 0.1 * jax.random.normal(kb, (n,), jnp.float32)
        mean = 0.1 * jax.random.normal(km, (n,), jnp.float32)
        var = 1.0 + 0.1 * jnp.abs(jax.random.normal(kv, (n,), jnp.float32))
        scale = gamma / jnp.sqrt(var + eps)
        return scale, beta - mean * scale

    # torch-convention (OIHW) weights
    w_fc1_t = nrm(ks[0], (Cmid, C, 1, 1))
    w_fc2_t = nrm(ks[1], (C, Cmid, 1, 1))
    b_fc2 = nrm(ks[2], (C,))
    w_c21_t = nrm(ks[3], (C2, C4, 3, 3))      # groups=2
    w_c22a_t = nrm(ks[4], (C4, C2, 1, 1))
    w_c22b_t = nrm(ks[5], (C4, C8, 3, 3))     # groups=2
    s_fc, b_fc = bn(ks[6], Cmid)
    s_c21, b_c21 = bn(ks[7], C2)
    s_c22a, b_c22a = bn(ks[8], C4)
    s_c22b, b_c22b = bn(ks[9], C4)

    torch_p = dict(w_fc1_t=w_fc1_t, w_fc2_t=w_fc2_t, b_fc2=b_fc2,
                   w_c21_t=w_c21_t, w_c22a_t=w_c22a_t, w_c22b_t=w_c22b_t,
                   s_fc=s_fc, b_fc=b_fc, s_c21=s_c21, b_c21=b_c21,
                   s_c22a=s_c22a, b_c22a=b_c22a, s_c22b=s_c22b, b_c22b=b_c22b)

    def blockdiag_im2col(w_t, groups):
        # torch grouped OIHW (Cout, Cin_g, 3, 3) -> (9*Cin, Cout) block-diagonal im2col weight
        Cout, cin_g = w_t.shape[0], w_t.shape[1]
        cout_g = Cout // groups
        Cin = cin_g * groups
        taps = []
        for ky in range(3):
            for kx in range(3):
                m = jnp.zeros((Cin, Cout), jnp.float32)
                for g in range(groups):
                    blk = jnp.transpose(w_t[g * cout_g:(g + 1) * cout_g, :, ky, kx], (1, 0))
                    m = m.at[g * cin_g:(g + 1) * cin_g, g * cout_g:(g + 1) * cout_g].set(blk)
                taps.append(m)
        return jnp.concatenate(taps, axis=0)

    w_fc2_k = jnp.transpose(w_fc2_t[:, :, 0, 0], (1, 0))               # (Cmid, C)
    b_fc2_k = b_fc2.reshape(1, C)

    kernel_p = dict(
        w_fc1=jnp.transpose(w_fc1_t[:, :, 0, 0], (1, 0)),              # (C, Cmid)
        s_fc=s_fc.reshape(1, Cmid), b_fc=b_fc.reshape(1, Cmid),
        w_fc2=w_fc2_k, b_fc2=b_fc2_k,
        w_fc2f=w_fc2_k[:, ::-1], b_fc2f=b_fc2_k[:, ::-1],              # pre-flipped gate weights
        w21=blockdiag_im2col(w_c21_t, 2).astype(jnp.bfloat16),         # (9*C2, C2)
        s21=s_c21.reshape(1, C2), b21=b_c21.reshape(1, C2),
        w22a=jnp.transpose(w_c22a_t[:, :, 0, 0], (1, 0)).astype(jnp.bfloat16),   # (C2, C4)
        s22a=s_c22a.reshape(1, C4), b22a=b_c22a.reshape(1, C4),
        w22b=blockdiag_im2col(w_c22b_t, 2).astype(jnp.bfloat16),       # (9*C4, C4)
        s22b=s_c22b.reshape(1, C4), b22b=b_c22b.reshape(1, C4),
    )
    return torch_p, kernel_p


# ------------------------------- pure-JAX reference (mirrors PyTorch code) -------------------------------

def _bn_ref(x, scale, bias):
    return x * scale.reshape(1, -1, 1, 1) + bias.reshape(1, -1, 1, 1)


def slimconv_ref(x, tp):
    dn = ("NCHW", "OIHW", "NCHW")
    hp = lax.Precision.HIGHEST
    B, C, H, W = x.shape
    w = jnp.mean(x, axis=(2, 3), keepdims=True)
    w = lax.conv_general_dilated(w, tp["w_fc1_t"], (1, 1), "VALID",
                                 dimension_numbers=dn, precision=hp)
    w = jax.nn.relu(_bn_ref(w, tp["s_fc"], tp["b_fc"]))
    w = lax.conv_general_dilated(w, tp["w_fc2_t"], (1, 1), "VALID",
                                 dimension_numbers=dn, precision=hp)
    w = jax.nn.sigmoid(w + tp["b_fc2"].reshape(1, -1, 1, 1))
    w_f = jnp.flip(w, axis=1)
    out1, out2 = w * x, w_f * x
    C2 = C // 2
    ft1 = out1[:, :C2] + out1[:, C2:]
    ft2 = out2[:, :C2] + out2[:, C2:]
    o21 = lax.conv_general_dilated(ft1, tp["w_c21_t"], (1, 1), ((1, 1), (1, 1)),
                                   dimension_numbers=dn, feature_group_count=2, precision=hp)
    o21 = _bn_ref(o21, tp["s_c21"], tp["b_c21"])
    t = lax.conv_general_dilated(ft2, tp["w_c22a_t"], (1, 1), "VALID",
                                 dimension_numbers=dn, precision=hp)
    t = jax.nn.relu(_bn_ref(t, tp["s_c22a"], tp["b_c22a"]))
    o22 = lax.conv_general_dilated(t, tp["w_c22b_t"], (1, 1), ((1, 1), (1, 1)),
                                   dimension_numbers=dn, feature_group_count=2, precision=hp)
    o22 = _bn_ref(o22, tp["s_c22b"], tp["b_c22b"])
    return jnp.concatenate([o21, o22], axis=1)


if __name__ == "__main__":
    B, C, H, W = 2, 64, 8, 8          # in_planes=64 so in_planes//32 >= 1
    x = jax.random.normal(jax.random.PRNGKey(0), (B, C, H, W), jnp.float32)
    torch_p, kernel_p = make_params(C)

    out = slimconv_forward(x, kernel_p)
    out = jax.block_until_ready(out)

    ref = slimconv_ref(x, torch_p)
    assert out.shape == (B, C // 2 + C // 4, H, W), out.shape
    # bf16 matmul operands with f32 accumulation -> loosen tolerance vs pure-f32 reference
    np.testing.assert_allclose(np.asarray(out), np.asarray(ref), atol=3e-2, rtol=3e-2)
    print("KERNEL_OK")
</pallas_src>

<mosaic_0001>
module attributes {stable_mosaic.version = 11 : i64} {
  func.func @_slimconv_kernel(%arg0: i32, %arg1: memref<1x8x8x64xf32, #tpu.memory_space<vmem>>, %arg2: memref<64x2xf32, #tpu.memory_space<vmem>>, %arg3: memref<1x2xf32, #tpu.memory_space<vmem>>, %arg4: memref<1x2xf32, #tpu.memory_space<vmem>>, %arg5: memref<2x64xf32, #tpu.memory_space<vmem>>, %arg6: memref<1x64xf32, #tpu.memory_space<vmem>>, %arg7: memref<2x64xf32, #tpu.memory_space<vmem>>, %arg8: memref<1x64xf32, #tpu.memory_space<vmem>>, %arg9: memref<288x32xbf16, #tpu.memory_space<vmem>>, %arg10: memref<1x32xf32, #tpu.memory_space<vmem>>, %arg11: memref<1x32xf32, #tpu.memory_space<vmem>>, %arg12: memref<32x16xbf16, #tpu.memory_space<vmem>>, %arg13: memref<1x16xf32, #tpu.memory_space<vmem>>, %arg14: memref<1x16xf32, #tpu.memory_space<vmem>>, %arg15: memref<144x16xbf16, #tpu.memory_space<vmem>>, %arg16: memref<1x16xf32, #tpu.memory_space<vmem>>, %arg17: memref<1x16xf32, #tpu.memory_space<vmem>>, %arg18: memref<1x8x8x48xf32, #tpu.memory_space<vmem>>, %arg19: memref<10x10x32xf32, #tpu.memory_space<vmem>>, %arg20: memref<10x10x16xf32, #tpu.memory_space<vmem>>) attributes {dimension_semantics = [#tpu.dimension_semantics<parallel>], iteration_bounds = array<i64: 2>, scalar_prefetch = 0 : i64, scratch_operands = 2 : i64, tpu.core_type = #tpu.core_type<tc>, window_params = [{transform_indices = @transform_0, window_bounds = array<i64: 1, 8, 8, 64>}, {pipeline_mode = #tpu.pipeline_mode<synchronous>, transform_indices = @transform_1, window_bounds = array<i64: 64, 2>}, {pipeline_mode = #tpu.pipeline_mode<synchronous>, transform_indices = @transform_2, window_bounds = array<i64: 1, 2>}, {pipeline_mode = #tpu.pipeline_mode<synchronous>, transform_indices = @transform_3, window_bounds = array<i64: 1, 2>}, {pipeline_mode = #tpu.pipeline_mode<synchronous>, transform_indices = @transform_4, window_bounds = array<i64: 2, 64>}, {pipeline_mode = #tpu.pipeline_mode<synchronous>, transform_indices = @transform_5, window_bounds = array<i64: 1, 64>}, {pipeline_mode = #tpu.pipeline_mode<synchronous>, transform_indices = @transform_6, window_bounds = array<i64: 2, 64>}, {pipeline_mode = #tpu.pipeline_mode<synchronous>, transform_indices = @transform_7, window_bounds = array<i64: 1, 64>}, {pipeline_mode = #tpu.pipeline_mode<synchronous>, transform_indices = @transform_8, window_bounds = array<i64: 288, 32>}, {pipeline_mode = #tpu.pipeline_mode<synchronous>, transform_indices = @transform_9, window_bounds = array<i64: 1, 32>}, {pipeline_mode = #tpu.pipeline_mode<synchronous>, transform_indices = @transform_10, window_bounds = array<i64: 1, 32>}, {pipeline_mode = #tpu.pipeline_mode<synchronous>, transform_indices = @transform_11, window_bounds = array<i64: 32, 16>}, {pipeline_mode = #tpu.pipeline_mode<synchronous>, transform_indices = @transform_12, window_bounds = array<i64: 1, 16>}, {pipeline_mode = #tpu.pipeline_mode<synchronous>, transform_indices = @transform_13, window_bounds = array<i64: 1, 16>}, {pipeline_mode = #tpu.pipeline_mode<synchronous>, transform_indices = @transform_14, window_bounds = array<i64: 144, 16>}, {pipeline_mode = #tpu.pipeline_mode<synchronous>, transform_indices = @transform_15, window_bounds = array<i64: 1, 16>}, {pipeline_mode = #tpu.pipeline_mode<synchronous>, transform_indices = @transform_16, window_bounds = array<i64: 1, 16>}, {transform_indices = @transform_17, window_bounds = array<i64: 1, 8, 8, 48>}]} {
    %c0 = arith.constant 0 : index
    %c0_0 = arith.constant 0 : index
    %c0_1 = arith.constant 0 : index
    %c0_2 = arith.constant 0 : index
    %0 = vector.load %arg1[%c0, %c0_0, %c0_1, %c0_2] : memref<1x8x8x64xf32, #tpu.memory_space<vmem>>, vector<1x8x8x64xf32>
    %1 = vector.shape_cast %0 : vector<1x8x8x64xf32> to vector<8x8x64xf32>
    %2 = vector.shape_cast %1 : vector<8x8x64xf32> to vector<64x64xf32>
    %cst = arith.constant dense<0.000000e+00> : vector<64xf32>
    %3 = vector.multi_reduction <add>, %2, %cst [0] : vector<64x64xf32> to vector<64xf32>
    %4 = vector.shape_cast %3 : vector<64xf32> to vector<1x64xf32>
    %cst_3 = arith.constant 6.400000e+01 : f32
    %5 = vector.broadcast %cst_3 : f32 to vector<1x64xf32>
    %6 = arith.divf %4, %5 : vector<1x64xf32>
    %c0_4 = arith.constant 0 : index
    %c0_5 = arith.constant 0 : index
    %7 = vector.load %arg2[%c0_4, %c0_5] : memref<64x2xf32, #tpu.memory_space<vmem>>, vector<64x2xf32>
    %cst_6 = arith.constant dense<0.000000e+00> : vector<1x2xf32>
    %8 = tpu.matmul %6, %7, %cst_6 {dimension_numbers = #tpu.dot_dimension_numbers<[1], [0], [0], [1], [0, 0, 1, 1], [], []>, precision = #tpu.contract_precision<fp32>} : vector<1x64xf32>, vector<64x2xf32>, vector<1x2xf32> -> vector<1x2xf32>
    %c0_7 = arith.constant 0 : index
    %c0_8 = arith.constant 0 : index
    %9 = vector.load %arg3[%c0_7, %c0_8] : memref<1x2xf32, #tpu.memory_space<vmem>>, vector<1x2xf32>
    %10 = arith.mulf %8, %9 : vector<1x2xf32>
    %c0_9 = arith.constant 0 : index
    %c0_10 = arith.constant 0 : index
    %11 = vector.load %arg4[%c0_9, %c0_10] : memref<1x2xf32, #tpu.memory_space<vmem>>, vector<1x2xf32>
    %12 = arith.addf %10, %11 : vector<1x2xf32>
    %cst_11 = arith.constant 0.000000e+00 : f32
    %13 = vector.broadcast %cst_11 : f32 to vector<1x2xf32>
    %14 = arith.maximumf %12, %13 : vector<1x2xf32>
    %c0_12 = arith.constant 0 : index
    %c0_13 = arith.constant 0 : index
    %15 = vector.load %arg5[%c0_12, %c0_13] : memref<2x64xf32, #tpu.memory_space<vmem>>, vector<2x64xf32>
    %cst_14 = arith.constant dense<0.000000e+00> : vector<1x64xf32>
    %16 = tpu.matmul %14, %15, %cst_14 {dimension_numbers = #tpu.dot_dimension_numbers<[1], [0], [0], [1], [0, 0, 1, 1], [], []>, precision = #tpu.contract_precision<fp32>} : vector<1x2xf32>, vector<2x64xf32>, vector<1x64xf32> -> vector<1x64xf32>
    %c0_15 = arith.constant 0 : index
    %c0_16 = arith.constant 0 : index
    %17 = vector.load %arg6[%c0_15, %c0_16] : memref<1x64xf32, #tpu.memory_space<vmem>>, vector<1x64xf32>
    %18 = arith.addf %16, %17 : vector<1x64xf32>
    %19 = arith.negf %18 : vector<1x64xf32>
    %20 = math.exp %19 : vector<1x64xf32>
    %cst_17 = arith.constant 1.000000e+00 : f32
    %21 = vector.broadcast %cst_17 : f32 to vector<1x64xf32>
    %22 = arith.addf %21, %20 : vector<1x64xf32>
    %23 = arith.divf %21, %22 : vector<1x64xf32>
    %c0_18 = arith.constant 0 : index
    %c0_19 = arith.constant 0 : index
    %24 = vector.load %arg7[%c0_18, %c0_19] : memref<2x64xf32, #tpu.memory_space<vmem>>, vector<2x64xf32>
    %cst_20 = arith.constant dense<0.000000e+00> : vector<1x64xf32>
    %25 = tpu.matmul %14, %24, %cst_20 {dimension_numbers = #tpu.dot_dimension_numbers<[1], [0], [0], [1], [0, 0, 1, 1], [], []>, precision = #tpu.contract_precision<fp32>} : vector<1x2xf32>, vector<2x64xf32>, vector<1x64xf32> -> vector<1x64xf32>
    %c0_21 = arith.constant 0 : index
    %c0_22 = arith.constant 0 : index
    %26 = vector.load %arg8[%c0_21, %c0_22] : memref<1x64xf32, #tpu.memory_space<vmem>>, vector<1x64xf32>
    %27 = arith.addf %25, %26 : vector<1x64xf32>
    %28 = arith.negf %27 : vector<1x64xf32>
    %29 = math.exp %28 : vector<1x64xf32>
    %cst_23 = arith.constant 1.000000e+00 : f32
    %30 = vector.broadcast %cst_23 : f32 to vector<1x64xf32>
    %31 = arith.addf %30, %29 : vector<1x64xf32>
    %32 = arith.divf %30, %31 : vector<1x64xf32>
    %33 = vector.extract_strided_slice %1 {offsets = [0, 0, 0], sizes = [8, 8, 32], strides = [1, 1, 1]} : vector<8x8x64xf32> to vector<8x8x32xf32>
    %34 = vector.extract_strided_slice %1 {offsets = [0, 0, 32], sizes = [8, 8, 32], strides = [1, 1, 1]} : vector<8x8x64xf32> to vector<8x8x32xf32>
    %35 = vector.extract_strided_slice %23 {offsets = [0, 0], sizes = [1, 32], strides = [1, 1]} : vector<1x64xf32> to vector<1x32xf32>
    %36 = vector.shape_cast %35 : vector<1x32xf32> to vector<1x1x32xf32>
    %37 = vector.extract_strided_slice %23 {offsets = [0, 32], sizes = [1, 32], strides = [1, 1]} : vector<1x64xf32> to vector<1x32xf32>
    %38 = vector.shape_cast %37 : vector<1x32xf32> to vector<1x1x32xf32>
    %39 = vector.extract_strided_slice %32 {offsets = [0, 0], sizes = [1, 32], strides = [1, 1]} : vector<1x64xf32> to vector<1x32xf32>
    %40 = vector.shape_cast %39 : vector<1x32xf32> to vector<1x1x32xf32>
    %41 = vector.extract_strided_slice %32 {offsets = [0, 32], sizes = [1, 32], strides = [1, 1]} : vector<1x64xf32> to vector<1x32xf32>
    %42 = vector.shape_cast %41 : vector<1x32xf32> to vector<1x1x32xf32>
    %43 = vector.broadcast %36 : vector<1x1x32xf32> to vector<8x8x32xf32>
    %44 = arith.mulf %43, %33 : vector<8x8x32xf32>
    %45 = vector.broadcast %38 : vector<1x1x32xf32> to vector<8x8x32xf32>
    %46 = arith.mulf %45, %34 : vector<8x8x32xf32>
    %47 = arith.addf %44, %46 : vector<8x8x32xf32>
    %48 = vector.broadcast %40 : vector<1x1x32xf32> to vector<8x8x32xf32>
    %49 = arith.mulf %48, %33 : vector<8x8x32xf32>
    %50 = vector.broadcast %42 : vector<1x1x32xf32> to vector<8x8x32xf32>
    %51 = arith.mulf %50, %34 : vector<8x8x32xf32>
    %52 = arith.addf %49, %51 : vector<8x8x32xf32>
    %cst_24 = arith.constant 0.000000e+00 : f32
    %53 = vector.broadcast %cst_24 : f32 to vector<10x10x32xf32>
    %c0_25 = arith.constant 0 : index
    %c0_26 = arith.constant 0 : index
    %c0_27 = arith.constant 0 : index
    %54 = vector.load %arg19[%c0_25, %c0_26, %c0_27] : memref<10x10x32xf32, #tpu.memory_space<vmem>>, vector<10x10x32xf32>
    tpu.vector_store %arg19[%c0_25, %c0_26, %c0_27], %53 {strides = array<i32>} : memref<10x10x32xf32, #tpu.memory_space<vmem>>, vector<10x10x32xf32>,
    %c1 = arith.constant 1 : index
    %c1_28 = arith.constant 1 : index
    %c0_29 = arith.constant 0 : index
    %55 = vector.load %arg19[%c1, %c1_28, %c0_29] : memref<10x10x32xf32, #tpu.memory_space<vmem>>, vector<8x8x32xf32>
    tpu.vector_store %arg19[%c1, %c1_28, %c0_29], %47 {strides = array<i32>} : memref<10x10x32xf32, #tpu.memory_space<vmem>>, vector<8x8x32xf32>,
    %c0_30 = arith.constant 0 : index
    %c0_31 = arith.constant 0 : index
    %c0_32 = arith.constant 0 : index
    %56 = vector.load %arg19[%c0_30, %c0_31, %c0_32] : memref<10x10x32xf32, #tpu.memory_space<vmem>>, vector<8x8x32xf32>
    %57 = vector.shape_cast %56 : vector<8x8x32xf32> to vector<64x32xf32>
    %c0_33 = arith.constant 0 : index
    %c1_34 = arith.constant 1 : index
    %c0_35 = arith.constant 0 : index
    %58 = vector.load %arg19[%c0_33, %c1_34, %c0_35] : memref<10x10x32xf32, #tpu.memory_space<vmem>>, vector<8x8x32xf32>
    %59 = vector.shape_cast %58 : vector<8x8x32xf32> to vector<64x32xf32>
    %c0_36 = arith.constant 0 : index
    %c2 = arith.constant 2 : index
    %c0_37 = arith.constant 0 : index
    %60 = vector.load %arg19[%c0_36, %c2, %c0_37] : memref<10x10x32xf32, #tpu.memory_space<vmem>>, vector<8x8x32xf32>
    %61 = vector.shape_cast %60 : vector<8x8x32xf32> to vector<64x32xf32>
    %c1_38 = arith.constant 1 : index
    %c0_39 = arith.constant 0 : index
    %c0_40 = arith.constant 0 : index
    %62 = vector.load %arg19[%c1_38, %c0_39, %c0_40] : memref<10x10x32xf32, #tpu.memory_space<vmem>>, vector<8x8x32xf32>
    %63 = vector.shape_cast %62 : vector<8x8x32xf32> to vector<64x32xf32>
    %c1_41 = arith.constant 1 : index
    %c1_42 = arith.constant 1 : index
    %c0_43 = arith.constant 0 : index
    %64 = vector.load %arg19[%c1_41, %c1_42, %c0_43] : memref<10x10x32xf32, #tpu.memory_space<vmem>>, vector<8x8x32xf32>
    %65 = vector.shape_cast %64 : vector<8x8x32xf32> to vector<64x32xf32>
    %c1_44 = arith.constant 1 : index
    %c2_45 = arith.constant 2 : index
    %c0_46 = arith.constant 0 : index
    %66 = vector.load %arg19[%c1_44, %c2_45, %c0_46] : memref<10x10x32xf32, #tpu.memory_space<vmem>>, vector<8x8x32xf32>
    %67 = vector.shape_cast %66 : vector<8x8x32xf32> to vector<64x32xf32>
    %c2_47 = arith.constant 2 : index
    %c0_48 = arith.constant 0 : index
    %c0_49 = arith.constant 0 : index
    %68 = vector.load %arg19[%c2_47, %c0_48, %c0_49] : memref<10x10x32xf32, #tpu.memory_space<vmem>>, vector<8x8x32xf32>
    %69 = vector.shape_cast %68 : vector<8x8x32xf32> to vector<64x32xf32>
    %c2_50 = arith.constant 2 : index
    %c1_51 = arith.constant 1 : index
    %c0_52 = arith.constant 0 : index
    %70 = vector.load %arg19[%c2_50, %c1_51, %c0_52] : memref<10x10x32xf32, #tpu.memory_space<vmem>>, vector<8x8x32xf32>
    %71 = vector.shape_cast %70 : vector<8x8x32xf32> to vector<64x32xf32>
    %c2_53 = arith.constant 2 : index
    %c2_54 = arith.constant 2 : index
    %c0_55 = arith.constant 0 : index
    %72 = vector.load %arg19[%c2_53, %c2_54, %c0_55] : memref<10x10x32xf32, #tpu.memory_space<vmem>>, vector<8x8x32xf32>
    %73 = vector.shape_cast %72 : vector<8x8x32xf32> to vector<64x32xf32>
    %74 = tpu.concatenate %57, %59, %61, %63, %65, %67, %69, %71, %73 in 1 : vector<64x32xf32>, vector<64x32xf32>, vector<64x32xf32>, vector<64x32xf32>, vector<64x32xf32>, vector<64x32xf32>, vector<64x32xf32>, vector<64x32xf32>, vector<64x32xf32> -> vector<64x288xf32>
    %75 = arith.truncf %74 : vector<64x288xf32> to vector<64x288xbf16>
    %c0_56 = arith.constant 0 : index
    %c0_57 = arith.constant 0 : index
    %76 = vector.load %arg9[%c0_56, %c0_57] : memref<288x32xbf16, #tpu.memory_space<vmem>>, vector<288x32xbf16>
    %cst_58 = arith.constant dense<0.000000e+00> : vector<64x32xf32>
    %77 = tpu.matmul %75, %76, %cst_58 {dimension_numbers = #tpu.dot_dimension_numbers<[1], [0], [0], [1], [0, 0, 1, 1], [], []>} : vector<64x288xbf16>, vector<288x32xbf16>, vector<64x32xf32> -> vector<64x32xf32>
    %c0_59 = arith.constant 0 : index
    %c0_60 = arith.constant 0 : index
    %78 = vector.load %arg10[%c0_59, %c0_60] : memref<1x32xf32, #tpu.memory_space<vmem>>, vector<1x32xf32>
    %79 = vector.broadcast %78 : vector<1x32xf32> to vector<64x32xf32>
    %80 = arith.mulf %77, %79 : vector<64x32xf32>
    %c0_61 = arith.constant 0 : index
    %c0_62 = arith.constant 0 : index
    %81 = vector.load %arg11[%c0_61, %c0_62] : memref<1x32xf32, #tpu.memory_space<vmem>>, vector<1x32xf32>
    %82 = vector.broadcast %81 : vector<1x32xf32> to vector<64x32xf32>
    %83 = arith.addf %80, %82 : vector<64x32xf32>
    %84 = vector.shape_cast %52 : vector<8x8x32xf32> to vector<64x32xf32>
    %85 = arith.truncf %84 : vector<64x32xf32> to vector<64x32xbf16>
    %c0_63 = arith.constant 0 : index
    %c0_64 = arith.constant 0 : index
    %86 = vector.load %arg12[%c0_63, %c0_64] : memref<32x16xbf16, #tpu.memory_space<vmem>>, vector<32x16xbf16>
    %cst_65 = arith.constant dense<0.000000e+00> : vector<64x16xf32>
    %87 = tpu.matmul %85, %86, %cst_65 {dimension_numbers = #tpu.dot_dimension_numbers<[1], [0], [0], [1], [0, 0, 1, 1], [], []>} : vector<64x32xbf16>, vector<32x16xbf16>, vector<64x16xf32> -> vector<64x16xf32>
    %c0_66 = arith.constant 0 : index
    %c0_67 = arith.constant 0 : index
    %88 = vector.load %arg13[%c0_66, %c0_67] : memref<1x16xf32, #tpu.memory_space<vmem>>, vector<1x16xf32>
    %89 = vector.broadcast %88 : vector<1x16xf32> to vector<64x16xf32>
    %90 = arith.mulf %87, %89 : vector<64x16xf32>
    %c0_68 = arith.constant 0 : index
    %c0_69 = arith.constant 0 : index
    %91 = vector.load %arg14[%c0_68, %c0_69] : memref<1x16xf32, #tpu.memory_space<vmem>>, vector<1x16xf32>
    %92 = vector.broadcast %91 : vector<1x16xf32> to vector<64x16xf32>
    %93 = arith.addf %90, %92 : vector<64x16xf32>
    %cst_70 = arith.constant 0.000000e+00 : f32
    %94 = vector.broadcast %cst_70 : f32 to vector<64x16xf32>
    %95 = arith.maximumf %93, %94 : vector<64x16xf32>
    %cst_71 = arith.constant 0.000000e+00 : f32
    %96 = vector.broadcast %cst_71 : f32 to vector<10x10x16xf32>
    %c0_72 = arith.constant 0 : index
    %c0_73 = arith.constant 0 : index
    %c0_74 = arith.constant 0 : index
    %97 = vector.load %arg20[%c0_72, %c0_73, %c0_74] : memref<10x10x16xf32, #tpu.memory_space<vmem>>, vector<10x10x16xf32>
    tpu.vector_store %arg20[%c0_72, %c0_73, %c0_74], %96 {strides = array<i32>} : memref<10x10x16xf32, #tpu.memory_space<vmem>>, vector<10x10x16xf32>,
    %98 = vector.shape_cast %95 : vector<64x16xf32> to vector<8x8x16xf32>
    %c1_75 = arith.constant 1 : index
    %c1_76 = arith.constant 1 : index
    %c0_77 = arith.constant 0 : index
    %99 = vector.load %arg20[%c1_75, %c1_76, %c0_77] : memref<10x10x16xf32, #tpu.memory_space<vmem>>, vector<8x8x16xf32>
    tpu.vector_store %arg20[%c1_75, %c1_76, %c0_77], %98 {strides = array<i32>} : memref<10x10x16xf32, #tpu.memory_space<vmem>>, vector<8x8x16xf32>,
    %c0_78 = arith.constant 0 : index
    %c0_79 = arith.constant 0 : index
    %c0_80 = arith.constant 0 : index
    %100 = vector.load %arg20[%c0_78, %c0_79, %c0_80] : memref<10x10x16xf32, #tpu.memory_space<vmem>>, vector<8x8x16xf32>
    %101 = vector.shape_cast %100 : vector<8x8x16xf32> to vector<64x16xf32>
    %c0_81 = arith.constant 0 : index
    %c1_82 = arith.constant 1 : index
    %c0_83 = arith.constant 0 : index
    %102 = vector.load %arg20[%c0_81, %c1_82, %c0_83] : memref<10x10x16xf32, #tpu.memory_space<vmem>>, vector<8x8x16xf32>
    %103 = vector.shape_cast %102 : vector<8x8x16xf32> to vector<64x16xf32>
    %c0_84 = arith.constant 0 : index
    %c2_85 = arith.constant 2 : index
    %c0_86 = arith.constant 0 : index
    %104 = vector.load %arg20[%c0_84, %c2_85, %c0_86] : memref<10x10x16xf32, #tpu.memory_space<vmem>>, vector<8x8x16xf32>
    %105 = vector.shape_cast %104 : vector<8x8x16xf32> to vector<64x16xf32>
    %c1_87 = arith.constant 1 : index
    %c0_88 = arith.constant 0 : index
    %c0_89 = arith.constant 0 : index
    %106 = vector.load %arg20[%c1_87, %c0_88, %c0_89] : memref<10x10x16xf32, #tpu.memory_space<vmem>>, vector<8x8x16xf32>
    %107 = vector.shape_cast %106 : vector<8x8x16xf32> to vector<64x16xf32>
    %c1_90 = arith.constant 1 : index
    %c1_91 = arith.constant 1 : index
    %c0_92 = arith.constant 0 : index
    %108 = vector.load %arg20[%c1_90, %c1_91, %c0_92] : memref<10x10x16xf32, #tpu.memory_space<vmem>>, vector<8x8x16xf32>
    %109 = vector.shape_cast %108 : vector<8x8x16xf32> to vector<64x16xf32>
    %c1_93 = arith.constant 1 : index
    %c2_94 = arith.constant 2 : index
    %c0_95 = arith.constant 0 : index
    %110 = vector.load %arg20[%c1_93, %c2_94, %c0_95] : memref<10x10x16xf32, #tpu.memory_space<vmem>>, vector<8x8x16xf32>
    %111 = vector.shape_cast %110 : vector<8x8x16xf32> to vector<64x16xf32>
    %c2_96 = arith.constant 2 : index
    %c0_97 = arith.constant 0 : index
    %c0_98 = arith.constant 0 : index
    %112 = vector.load %arg20[%c2_96, %c0_97, %c0_98] : memref<10x10x16xf32, #tpu.memory_space<vmem>>, vector<8x8x16xf32>
    %113 = vector.shape_cast %112 : vector<8x8x16xf32> to vector<64x16xf32>
    %c2_99 = arith.constant 2 : index
    %c1_100 = arith.constant 1 : index
    %c0_101 = arith.constant 0 : index
    %114 = vector.load %arg20[%c2_99, %c1_100, %c0_101] : memref<10x10x16xf32, #tpu.memory_space<vmem>>, vector<8x8x16xf32>
    %115 = vector.shape_cast %114 : vector<8x8x16xf32> to vector<64x16xf32>
    %c2_102 = arith.constant 2 : index
    %c2_103 = arith.constant 2 : index
    %c0_104 = arith.constant 0 : index
    %116 = vector.load %arg20[%c2_102, %c2_103, %c0_104] : memref<10x10x16xf32, #tpu.memory_space<vmem>>, vector<8x8x16xf32>
    %117 = vector.shape_cast %116 : vector<8x8x16xf32> to vector<64x16xf32>
    %118 = tpu.concatenate %101, %103, %105, %107, %109, %111, %113, %115, %117 in 1 : vector<64x16xf32>, vector<64x16xf32>, vector<64x16xf32>, vector<64x16xf32>, vector<64x16xf32>, vector<64x16xf32>, vector<64x16xf32>, vector<64x16xf32>, vector<64x16xf32> -> vector<64x144xf32>
    %119 = arith.truncf %118 : vector<64x144xf32> to vector<64x144xbf16>
    %c0_105 = arith.constant 0 : index
    %c0_106 = arith.constant 0 : index
    %120 = vector.load %arg15[%c0_105, %c0_106] : memref<144x16xbf16, #tpu.memory_space<vmem>>, vector<144x16xbf16>
    %cst_107 = arith.constant dense<0.000000e+00> : vector<64x16xf32>
    %121 = tpu.matmul %119, %120, %cst_107 {dimension_numbers = #tpu.dot_dimension_numbers<[1], [0], [0], [1], [0, 0, 1, 1], [], []>} : vector<64x144xbf16>, vector<144x16xbf16>, vector<64x16xf32> -> vector<64x16xf32>
    %c0_108 = arith.constant 0 : index
    %c0_109 = arith.constant 0 : index
    %122 = vector.load %arg16[%c0_108, %c0_109] : memref<1x16xf32, #tpu.memory_space<vmem>>, vector<1x16xf32>
    %123 = vector.broadcast %122 : vector<1x16xf32> to vector<64x16xf32>
    %124 = arith.mulf %121, %123 : vector<64x16xf32>
    %c0_110 = arith.constant 0 : index
    %c0_111 = arith.constant 0 : index
    %125 = vector.load %arg17[%c0_110, %c0_111] : memref<1x16xf32, #tpu.memory_space<vmem>>, vector<1x16xf32>
    %126 = vector.broadcast %125 : vector<1x16xf32> to vector<64x16xf32>
    %127 = arith.addf %124, %126 : vector<64x16xf32>
    %128 = tpu.concatenate %83, %127 in 1 : vector<64x32xf32>, vector<64x16xf32> -> vector<64x48xf32>
    %129 = vector.shape_cast %128 : vector<64x48xf32> to vector<8x8x48xf32>
    %c0_112 = arith.constant 0 : index
    %c0_113 = arith.constant 0 : index
    %c0_114 = arith.constant 0 : index
    %c0_115 = arith.constant 0 : index
    %130 = vector.load %arg18[%c0_112, %c0_113, %c0_114, %c0_115] : memref<1x8x8x48xf32, #tpu.memory_space<vmem>>, vector<1x8x8x48xf32>
    %131 = vector.shape_cast %130 : vector<1x8x8x48xf32> to vector<8x8x48xf32>
    %132 = vector.shape_cast %129 : vector<8x8x48xf32> to vector<1x8x8x48xf32>
    tpu.vector_store %arg18[%c0_112, %c0_113, %c0_114, %c0_115], %132 {strides = array<i32>} : memref<1x8x8x48xf32, #tpu.memory_space<vmem>>, vector<1x8x8x48xf32>,
    return
  }
  func.func @transform_0(%arg0: i32) -> (i32, i32, i32, i32) {
    %c0_i32 = arith.constant 0 : i32
    %c0_i32_0 = arith.constant 0 : i32
    %c0_i32_1 = arith.constant 0 : i32
    %c0_i32_2 = arith.constant 0 : i32
    return %arg0, %c0_i32, %c0_i32_0, %c0_i32_1 : i32, i32, i32, i32
  }
  func.func @transform_1(%arg0: i32) -> (i32, i32) {
    %c0_i32 = arith.constant 0 : i32
    %c0_i32_0 = arith.constant 0 : i32
    %c0_i32_1 = arith.constant 0 : i32
    return %c0_i32, %c0_i32_0 : i32, i32
  }
  func.func @transform_2(%arg0: i32) -> (i32, i32) {
    %c0_i32 = arith.constant 0 : i32
    %c0_i32_0 = arith.constant 0 : i32
    %c0_i32_1 = arith.constant 0 : i32
    return %c0_i32, %c0_i32_0 : i32, i32
  }
  func.func @transform_3(%arg0: i32) -> (i32, i32) {
    %c0_i32 = arith.constant 0 : i32
    %c0_i32_0 = arith.constant 0 : i32
    %c0_i32_1 = arith.constant 0 : i32
    return %c0_i32, %c0_i32_0 : i32, i32
  }
  func.func @transform_4(%arg0: i32) -> (i32, i32) {
    %c0_i32 = arith.constant 0 : i32
    %c0_i32_0 = arith.constant 0 : i32
    %c0_i32_1 = arith.constant 0 : i32
    return %c0_i32, %c0_i32_0 : i32, i32
  }
  func.func @transform_5(%arg0: i32) -> (i32, i32) {
    %c0_i32 = arith.constant 0 : i32
    %c0_i32_0 = arith.constant 0 : i32
    %c0_i32_1 = arith.constant 0 : i32
    return %c0_i32, %c0_i32_0 : i32, i32
  }
  func.func @transform_6(%arg0: i32) -> (i32, i32) {
    %c0_i32 = arith.constant 0 : i32
    %c0_i32_0 = arith.constant 0 : i32
    %c0_i32_1 = arith.constant 0 : i32
    return %c0_i32, %c0_i32_0 : i32, i32
  }
  func.func @transform_7(%arg0: i32) -> (i32, i32) {
    %c0_i32 = arith.constant 0 : i32
    %c0_i32_0 = arith.constant 0 : i32
    %c0_i32_1 = arith.constant 0 : i32
    return %c0_i32, %c0_i32_0 : i32, i32
  }
  func.func @transform_8(%arg0: i32) -> (i32, i32) {
    %c0_i32 = arith.constant 0 : i32
    %c0_i32_0 = arith.constant 0 : i32
    %c0_i32_1 = arith.constant 0 : i32
    return %c0_i32, %c0_i32_0 : i32, i32
  }
  func.func @transform_9(%arg0: i32) -> (i32, i32) {
    %c0_i32 = arith.constant 0 : i32
    %c0_i32_0 = arith.constant 0 : i32
    %c0_i32_1 = arith.constant 0 : i32
    return %c0_i32, %c0_i32_0 : i32, i32
  }
  func.func @transform_10(%arg0: i32) -> (i32, i32) {
    %c0_i32 = arith.constant 0 : i32
    %c0_i32_0 = arith.constant 0 : i32
    %c0_i32_1 = arith.constant 0 : i32
    return %c0_i32, %c0_i32_0 : i32, i32
  }
  func.func @transform_11(%arg0: i32) -> (i32, i32) {
    %c0_i32 = arith.constant 0 : i32
    %c0_i32_0 = arith.constant 0 : i32
    %c0_i32_1 = arith.constant 0 : i32
    return %c0_i32, %c0_i32_0 : i32, i32
  }
  func.func @transform_12(%arg0: i32) -> (i32, i32) {
    %c0_i32 = arith.constant 0 : i32
    %c0_i32_0 = arith.constant 0 : i32
    %c0_i32_1 = arith.constant 0 : i32
    return %c0_i32, %c0_i32_0 : i32, i32
  }
  func.func @transform_13(%arg0: i32) -> (i32, i32) {
    %c0_i32 = arith.constant 0 : i32
    %c0_i32_0 = arith.constant 0 : i32
    %c0_i32_1 = arith.constant 0 : i32
    return %c0_i32, %c0_i32_0 : i32, i32
  }
  func.func @transform_14(%arg0: i32) -> (i32, i32) {
    %c0_i32 = arith.constant 0 : i32
    %c0_i32_0 = arith.constant 0 : i32
    %c0_i32_1 = arith.constant 0 : i32
    return %c0_i32, %c0_i32_0 : i32, i32
  }
  func.func @transform_15(%arg0: i32) -> (i32, i32) {
    %c0_i32 = arith.constant 0 : i32
    %c0_i32_0 = arith.constant 0 : i32
    %c0_i32_1 = arith.constant 0 : i32
    return %c0_i32, %c0_i32_0 : i32, i32
  }
  func.func @transform_16(%arg0: i32) -> (i32, i32) {
    %c0_i32 = arith.constant 0 : i32
    %c0_i32_0 = arith.constant 0 : i32
    %c0_i32_1 = arith.constant 0 : i32
    return %c0_i32, %c0_i32_0 : i32, i32
  }
  func.func @transform_17(%arg0: i32) -> (i32, i32, i32, i32) {
    %c0_i32 = arith.constant 0 : i32
    %c0_i32_0 = arith.constant 0 : i32
    %c0_i32_1 = arith.constant 0 : i32
    %c0_i32_2 = arith.constant 0 : i32
    return %arg0, %c0_i32, %c0_i32_0, %c0_i32_1 : i32, i32, i32, i32
  }
}

</mosaic_0001>

<bundles_post_ra>
// kernel: tpu_custom_call.1
= control target key start
LH: loop header
LB: loop body
LE: loop exit
PB: predicated region body
PF: predicated region fallthrough
CT: control target
= control target key end

     0   :  { %s5721_s0 = inlined_call_operand.vmem [shape: f32[2,8,8,64], index: 0, kind: input, shape index: {}]   ;;  %s5722_s1 = inlined_call_operand.vmem [shape: f32[64,2], index: 1, kind: input, shape index: {}]   ;;  %s5723_s2 = inlined_call_operand.vmem [shape: f32[1,2], index: 2, kind: input, shape index: {}]   ;;  %s5724_s3 = inlined_call_operand.vmem [shape: f32[1,2], index: 3, kind: input, shape index: {}]   ;;  %s5725_s4 = inlined_call_operand.vmem [shape: f32[2,64], index: 4, kind: input, shape index: {}]   ;;  %s5726_s5 = inlined_call_operand.vmem [shape: f32[1,64], index: 5, kind: input, shape index: {}]   ;;  %s5727_s6 = inlined_call_operand.vmem [shape: f32[2,64], index: 6, kind: input, shape index: {}]   ;;  %s5728_s7 = inlined_call_operand.vmem [shape: f32[1,64], index: 7, kind: input, shape index: {}]   ;;  %s5729_s8 = inlined_call_operand.vmem [shape: bf16[288,32], index: 8, kind: input, shape index: {}]   ;;  %s5730_s9 = inlined_call_operand.vmem [shape: f32[1,32], index: 9, kind: input, shape index: {}]   ;;  %s5731_s10 = inlined_call_operand.vmem [shape: f32[1,32], index: 10, kind: input, shape index: {}]   ;;  %s5732_s11 = inlined_call_operand.vmem [shape: bf16[32,16], index: 11, kind: input, shape index: {}]   ;;  %s5733_s12 = inlined_call_operand.vmem [shape: f32[1,16], index: 12, kind: input, shape index: {}]   ;;  %s5734_s13 = inlined_call_operand.vmem [shape: f32[1,16], index: 13, kind: input, shape index: {}]   ;;  %s5735_s14 = inlined_call_operand.vmem [shape: bf16[144,16], index: 14, kind: input, shape index: {}]   ;;  %s5736_s15 = inlined_call_operand.vmem [shape: f32[1,16], index: 15, kind: input, shape index: {}]   ;;  %s5737_s16 = inlined_call_operand.vmem [shape: f32[1,16], index: 16, kind: input, shape index: {}]   ;;  %s5738_s17 = inlined_call_operand.hbm [shape: f32[2,8,8,48], index: 17, kind: output, shape index: {}]  }
   0x1   :  { %5752 = sst [smem:[#allocation12_spill]] %s5721_s0 }
   0x2   :  { %5753 = sst [smem:[#allocation13_spill]] %s5722_s1 }
   0x3   :  { %5754 = sst [smem:[#allocation14_spill]] %s5723_s2 }
   0x4   :  { %22 = vsyncpa [#allocation5], 0 }
   0x5   :  { %24 = vsyncpa [#allocation5 + $0x1], 0  ;;  %s4566_s24 = smov 0   ;;  %s4568_s25 = smov 0  }
   0x6   :  { %s4570_s26 = smov 0   ;;  %s4572_s27 = smov 0  }
   0x7 LB: > { %5755 = sst [smem:[#allocation7_spill]] %s4449_s24  ;;  %s4587_s28 = sadd.s32 4294967295, %s4461_s27   ;;  %s4461_s27 = sphi %s4572_s27, %s5771_s27   ;;  %s4457_s26 = sphi %s4570_s26, %s5773_s26   ;;  %s4453_s25 = sphi %s4568_s25, %s5775_s25   ;;  %s4449_s24 = sphi %s4566_s24, %s5774_s24  }
   0x8   : > { %5756 = sst [smem:[#allocation8_spill]] %s4457_s26  ;;  %s3662_s29 = sadd.s32 4294967294, %s4461_s27  }
   0x9   : > { %s4591_s0 = sadd.s32 1, %s4461_s27   ;;  %s399_s30 = sadd.s32 1, %s4457_s26 }
   0xa   : > { %5757 = sst [smem:[#allocation9_spill]] %s4591_s0  ;;  %s396_s18 = ssub.s32 %s4461_s27, %s4591_s0 }
   0xb   : > { %p409_p0 = scmp.ne.s32.totalorder %s4457_s26, %s4453_s25  ;;  %p397_p1 = scmp.eq.s32.totalorder %s396_s18, 0 }
   0xc   : > { %p410_p2 = scmp.eq.s32.totalorder %s4587_s28, 1  ;;  %p415_p3 = scmp.ne.s32.totalorder %s4453_s25, %s4449_s24 }
   0xd   : > { %p416_p4 = scmp.eq.s32.totalorder %s3662_s29, 1  ;;  %p3665_p7 = scmp.ge.s32.totalorder %s4461_s27, 1 }
   0xe   : > { %s4602_s19 = scalar_select %p397_p1, %s4457_s26, %s399_s30  }
   0xf   : > { %p4604_p5 = por %p410_p2, %p409_p0  ;;  %p4608_p6 = por %p416_p4, %p415_p3 }
  0x10   : > { %5758 = sst [smem:[#allocation10_spill]] %s4602_s19  ;;  %p490_p8 = scmp.lt.s32.totalorder %s4461_s27, 3 }
  0x11   : > { %s5760_s20 = scalar_select %p4608_p6, 1, 0 }
  0x12   : > { %p491_p9 = pnand %p3665_p7, %p490_p8 }
  0x13   : > { %5761 = sst [smem:[#allocation11_spill]] %s5760_s20  ;;  %p542_p10 = scmp.lt.s32.totalorder (!%p491_p9), %s4587_s28, 1 }
  0x14   : > { %494 = sbr.rel (%p491_p9) target bundleno = 1437 (0x59d), region = 88  ;;  %s5762_s23 = sld [smem:[#allocation13_spill]] (!%p491_p9) }
  0x15   : > { %s5763_s20 = sld [smem:[#allocation12_spill]] (!%p491_p9)  ;;  %s4465_s26 = smov (!%p491_p9), 96  }
  0x16   : > { %s5764_s2 = sld [smem:[#allocation14_spill]] (!%p491_p9)  ;;  %s5747_s29 = smov (!%p491_p9), 32  }
  0x17   : > { %s5749_s30 = smov (!%p491_p9), 16   ;;  %s5750_s22 = smov (!%p491_p9), 64  }
  0x18   : > { %s4470_s0 = smov (!%p491_p9), 48   ;;  %s5765_s21 = smov (!%p491_p9), 80  }
  0x19   : > { %v4463_v3 = vmov 0.0   ;;  %vm4464_vm0 = vmmov 0   ;;  %s543_s19 = scalar_select %p542_p10, %s4587_s28, 1  ;;  %vm556_vm1 = vcmask 523264   ;;  %vm1139_vm2 = vcmask 1041408  }
  0x1a   : > { %v4617_v0 = vld [vmem:[%s5762_s23 + $0x38] sm:$0xff]  ;;  %v4622_v1 = vld [vmem:[%s5762_s23 + $0x30] sm:$0xff]  ;;  %v4627_v2 = vld [vmem:[%s5762_s23 + $0x28] sm:$0xff]  ;;  %3855 = vmatprep.subr.mxu0 %v4463_v3  ;;  %3871 = vmatprep.mubr.msk.f32.mxu0 %vm4464_vm0, %v4463_v3  ;;  %vm1135_vm3 = vcmask 15360   ;;  %vm2156_vm4 = vcmask 261120   ;;  %vm2158_vm5 = vcmask 254976  }
  0x1b   : > { %v4632_v4 = vand.u32 4294901760, %v4617_v0  ;;  %v4635_v5 = vand.u32 4294901760, %v4622_v1  ;;  %v4642_v6 = vld [vmem:[%s5762_s23 + $0x20] sm:$0xff]  ;;  %3912 = vmatprep.subr.mxu1 %v4463_v3  ;;  %3928 = vmatprep.mubr.msk.f32.mxu1 %vm4464_vm0, %v4463_v3  ;;  %v4650_v7 = vand.u32 4294901760, %v4627_v2  ;;  %v4657_v8 = vld [vmem:[%s5762_s23 + $0x18] sm:$0xff]  ;;  %s3723_s18 = sshll.u32 %s543_s19, 6 }
  0x1c   : > { %v4662_v9 = vand.u32 4294901760, %v4642_v6  ;;  %v4667_v10 = vld [vmem:[%s5762_s23 + $0x10] sm:$0xff]  ;;  %s4672_s24 = scalar_lea.vmem %s5763_s20, %s3723_s18  ;;  %v4688_v14 = vand.u32 4294901760, %v4657_v8  ;;  %v4704_v19 = vld [vmem:[%s5762_s23 + $0x8] sm:$0xff]  ;;  %v4717_v23 = vld [vmem:[%s5762_s23] sm:$0xff]  ;;  %2166 = vst.msk [vmem:[#allocation2 + $0x40] sm:$0xff] %vm2156_vm4, %v4463_v3 }
  0x1d   : > { %3856 = vmatpush3.msra.mxu0 %v4632_v4  ;;  %3913 = vmatpush3.msra.mxu1 %v4632_v4  ;;  %v4677_v11 = vld [vmem:[%s4672_s24] sm:$0xff]  ;;  %v4680_v12 = vld [vmem:[%s4672_s24 + $0x8] sm:$0xff]  ;;  %v4683_v13 = vld [vmem:[%s4672_s24 + $0x10] sm:$0xff]  ;;  %v4712_v22 = vand.u32 4294901760, %v4667_v10  ;;  %v4728_v27 = vand.u32 4294901760, %v4704_v19  ;;  %v4735_v29 = vand.u32 4294901760, %v4717_v23  ;;  %v4765_v45 = vsub.f32 %v4617_v0, %v4632_v4 }
  0x1e   : > { %3857 = vmatprep.subr.mxu0 %v4463_v3  ;;  %3914 = vmatprep.subr.mxu1 %v4463_v3  ;;  %v4691_v15 = vld [vmem:[%s4672_s24 + $0x18] sm:$0xff]  ;;  %v557_v16 = vsel %vm556_vm1, %v4677_v11, 0.0  ;;  %v558_v17 = vsel %vm556_vm1, %v4680_v12, 0.0  ;;  %v560_v18 = vsel %vm556_vm1, %v4683_v13, 0.0  ;;  %v4707_v20 = vld [vmem:[%s4672_s24 + $0x20] sm:$0xff]  ;;  %v4720_v24 = vld [vmem:[%s4672_s24 + $0x28] sm:$0xff]  ;;  %v4769_v47 = vsub.f32 %v4622_v1, %v4635_v5 }
  0x1f   : > { %3858 = vmatpush3.msra.mxu0 %v4635_v5  ;;  %3915 = vmatpush3.msra.mxu1 %v4635_v5  ;;  %v559_v21 = vadd.f32 %v558_v17, %v557_v16  ;;  %v562_v25 = vsel %vm556_vm1, %v4691_v15, 0.0  ;;  %v564_v28 = vsel %vm556_vm1, %v4707_v20, 0.0  ;;  %v4738_v30 = vld [vmem:[%s4672_s24 + $0x30] sm:$0xff]  ;;  %v4741_v31 = vld [vmem:[%s4672_s24 + $0x38] sm:$0xff]  ;;  %v566_v33 = vsel %vm556_vm1, %v4720_v24, 0.0  ;;  %2157 = vst.msk [vmem:[#allocation2] sm:$0xff] %vm2156_vm4, %v4463_v3 }
  0x20   : > { %3859 = vmatprep.subr.mxu0 %v4463_v3  ;;  %3916 = vmatprep.subr.mxu1 %v4463_v3  ;;  %v568_v35 = vsel %vm556_vm1, %v4738_v30, 0.0  ;;  %v570_v36 = vsel %vm556_vm1, %v4741_v31, 0.0  ;;  %v4773_v49 = vsub.f32 %v4627_v2, %v4650_v7  ;;  %v693_v51 = vand.u32 4294901760, %v4765_v45  ;;  %2167 = vst.msk [vmem:[#allocation2 + $0x48] sm:$0x3] %vm2158_vm5, %v4463_v3  ;;  %s5745_s24 = smov 80  }
  0x21   : > { %3860 = vmatpush3.msra.mxu0 %v4650_v7  ;;  %3917 = vmatpush3.msra.mxu1 %v4650_v7  ;;  %v561_v26 = vadd.f32 %v560_v18, %v559_v21  ;;  %v4781_v53 = vsub.f32 %v4642_v6, %v4662_v9  ;;  %v700_v54 = vand.u32 4294901760, %v4769_v47  ;;  %v4789_v56 = vsub.f32 %v4657_v8, %v4688_v14  ;;  %s4472_s18 = smov 112   ;;  %s539_s20 = sand.u32 1, %s4453_s25  }
  0x22   : > { %3861 = vmatprep.subr.mxu0 %v4463_v3  ;;  %3918 = vmatprep.subr.mxu1 %v4463_v3  ;;  %v694_v57 = vsub.f32 %v4765_v45, %v693_v51  ;;  %v707_v58 = vand.u32 4294901760, %v4773_v49  ;;  %v4798_v60 = vsub.f32 %v4667_v10, %v4712_v22  ;;  %v4807_v0 = vsub.f32 %v4704_v19, %v4728_v27  ;;  %s3724_s19 = sshll.u32 %s4587_s28, 10  ;;  %s5681_s28 = scalar_lea.sflag [#allocation5], %s539_s20 }
  0x23   : > { %3862 = vmatpush3.msra.mxu0 %v4662_v9  ;;  %3919 = vmatpush3.msra.mxu1 %v4662_v9  ;;  %v563_v32 = vadd.f32 %v562_v25, %v561_v26  ;;  %v701_v61 = vsub.f32 %v4769_v47, %v700_v54  ;;  %v714_v62 = vand.u32 4294901760, %v4781_v53  ;;  %v721_v6 = vand.u32 4294901760, %v4789_v56  ;;  %2159 = vst.msk [vmem:[#allocation2 + $0x8] sm:$0x3] %vm2158_vm5, %v4463_v3 }
  0x24   : > { %3863 = vmatprep.subr.mxu0 %v4463_v3  ;;  %3920 = vmatprep.subr.mxu1 %v4463_v3  ;;  %v695_v1 = vand.u32 4294901760, %v694_v57  ;;  %v708_v2 = vsub.f32 %v4773_v49, %v707_v58  ;;  %v4819_v10 = vsub.f32 %v4717_v23, %v4735_v29  ;;  %v728_v18 = vand.u32 4294901760, %v4798_v60  ;;  %v1130_v57 = vld [vmem:[%s5724_s3] sm:$0x1]  ;;  %2160 = vst.msk [vmem:[#allocation2 + $0x10] sm:$0xff] %vm2156_vm4, %v4463_v3 }
  0x25   : > { %3864 = vmatpush3.msra.mxu0 %v4688_v14  ;;  %3921 = vmatpush3.msra.mxu1 %v4688_v14  ;;  %v565_v34 = vadd.f32 %v564_v28, %v563_v32  ;;  %v702_v16 = vand.u32 4294901760, %v701_v61  ;;  %v715_v17 = vsub.f32 %v4781_v53, %v714_v62  ;;  %v722_v19 = vsub.f32 %v4789_v56, %v721_v6 }
  0x26   : > { %3865 = vmatprep.subr.mxu0 %v4463_v3  ;;  %3922 = vmatprep.subr.mxu1 %v4463_v3  ;;  %v735_v21 = vand.u32 4294901760, %v4807_v0  ;;  %v729_v23 = vsub.f32 %v4798_v60, %v728_v18  ;;  %v742_v25 = vand.u32 4294901760, %v4819_v10  ;;  %2161 = vst.msk [vmem:[#allocation2 + $0x18] sm:$0x3] %vm2158_vm5, %v4463_v3  ;;  %2163 = vst.msk [vmem:[#allocation2 + $0x28] sm:$0x3] %vm2158_vm5, %v4463_v3 }
  0x27   : > { %3866 = vmatpush3.msra.mxu0 %v4712_v22  ;;  %3923 = vmatpush3.msra.mxu1 %v4712_v22  ;;  %v567_v37 = vadd.f32 %v566_v33, %v565_v34  ;;  %v723_v26 = vand.u32 4294901760, %v722_v19  ;;  %2162 = vst.msk [vmem:[#allocation2 + $0x20] sm:$0xff] %vm2156_vm4, %v4463_v3  ;;  %2164 = vst.msk [vmem:[#allocation2 + $0x30] sm:$0xff] %vm2156_vm4, %v4463_v3  ;;  %vm2964_vm6 = vcmask 130048   ;;  %vm2966_vm7 = vcmask 123904  }
  0x28   : > { %3867 = vmatprep.subr.mxu0 %v4463_v3  ;;  %3924 = vmatprep.subr.mxu1 %v4463_v3  ;;  %v730_v28 = vand.u32 4294901760, %v729_v23  ;;  %v743_v32 = vsub.f32 %v4819_v10, %v742_v25  ;;  %2165 = vst.msk [vmem:[#allocation2 + $0x38] sm:$0x3] %vm2158_vm5, %v4463_v3  ;;  %2169 = vst.msk [vmem:[#allocation2 + $0x58] sm:$0x3] %vm2158_vm5, %v4463_v3  ;;  %vm3308_vm8 = vcmask 392192  }
  0x29   : > { %3868 = vmatpush3.msra.mxu0 %v4728_v27  ;;  %3925 = vmatpush3.msra.mxu1 %v4728_v27  ;;  %v569_v38 = vadd.f32 %v568_v35, %v567_v37  ;;  %2168 = vst.msk [vmem:[#allocation2 + $0x50] sm:$0xff] %vm2156_vm4, %v4463_v3  ;;  %2170 = vst.msk [vmem:[#allocation2 + $0x60] sm:$0xff] %vm2156_vm4, %v4463_v3  ;;  %vm3325_vm9 = vcmask 654336   ;;  %vm2468_vm10 = vcmask 785408   ;;  %vm3342_vm11 = vcmask 916480  }
  0x2a   : > { %3869 = vmatprep.subr.mxu0 %v4463_v3  ;;  %3926 = vmatprep.subr.mxu1 %v4463_v3  ;;  %2171 = vst.msk [vmem:[#allocation2 + $0x68] sm:$0x3] %vm2158_vm5, %v4463_v3  ;;  %2173 = vst.msk [vmem:[#allocation2 + $0x78] sm:$0x3] %vm2158_vm5, %v4463_v3 }
  0x2b   : > { %3870 = vmatpush3.msra.mxu0 %v4735_v29  ;;  %3927 = vmatpush3.msra.mxu1 %v4735_v29  ;;  %v571_v39 = vadd.f32 %v570_v36, %v569_v38  ;;  %2172 = vst.msk [vmem:[#allocation2 + $0x70] sm:$0xff] %vm2156_vm4, %v4463_v3  ;;  %2174 = vst.msk [vmem:[#allocation2 + $0x80] sm:$0xff] %vm2156_vm4, %v4463_v3 }
  0x2c   : > { %3874 = vmatprep.subr.mxu0 %v4463_v3  ;;  %3950 = vmatprep.subr.mxu1 %v4463_v3  ;;  %2175 = vst.msk [vmem:[#allocation2 + $0x88] sm:$0x3] %vm2158_vm5, %v4463_v3  ;;  %2177 = vst.msk [vmem:[#allocation2 + $0x98] sm:$0x3] %vm2158_vm5, %v4463_v3 }
  0x2d   : > { %v572_v40 = vrot.slane %v571_v39, 4  ;;  %2176 = vst.msk [vmem:[#allocation2 + $0x90] sm:$0xff] %vm2156_vm4, %v4463_v3 }
  0x2e   : > { %2972 = vst.msk [vmem:[#allocation3 + $0x30] sm:$0xff] %vm2964_vm6, %v4463_v3  ;;  %2965 = vst.msk [vmem:[#allocation3] sm:$0xff] %vm2964_vm6, %v4463_v3 }
  0x2f   : > { %v573_v41 = vadd.f32 %v572_v40, %v571_v39  ;;  %2973 = vst.msk [vmem:[#allocation3 + $0x38] sm:$0x3] %vm2966_vm7, %v4463_v3  ;;  %2967 = vst.msk [vmem:[#allocation3 + $0x8] sm:$0x3] %vm2966_vm7, %v4463_v3 }
  0x30   : > { %2968 = vst.msk [vmem:[#allocation3 + $0x10] sm:$0xff] %vm2964_vm6, %v4463_v3  ;;  %2970 = vst.msk [vmem:[#allocation3 + $0x20] sm:$0xff] %vm2964_vm6, %v4463_v3 }
  0x31   : > { %v574_v42 = vrot.slane %v573_v41, 2  ;;  %2969 = vst.msk [vmem:[#allocation3 + $0x18] sm:$0x3] %vm2966_vm7, %v4463_v3  ;;  %2971 = vst.msk [vmem:[#allocation3 + $0x28] sm:$0x3] %vm2966_vm7, %v4463_v3 }
  0x32   : > { %2974 = vst.msk [vmem:[#allocation3 + $0x40] sm:$0xff] %vm2964_vm6, %v4463_v3  ;;  %2976 = vst.msk [vmem:[#allocation3 + $0x50] sm:$0xff] %vm2964_vm6, %v4463_v3 }
  0x33   : > { %v575_v43 = vadd.f32 %v574_v42, %v573_v41  ;;  %2975 = vst.msk [vmem:[#allocation3 + $0x48] sm:$0x3] %vm2966_vm7, %v4463_v3  ;;  %2977 = vst.msk [vmem:[#allocation3 + $0x58] sm:$0x3] %vm2966_vm7, %v4463_v3 }
  0x34   : > { %2978 = vst.msk [vmem:[#allocation3 + $0x60] sm:$0xff] %vm2964_vm6, %v4463_v3  ;;  %2980 = vst.msk [vmem:[#allocation3 + $0x70] sm:$0xff] %vm2964_vm6, %v4463_v3 }
  0x35   : > { %v576_v44 = vrot.slane %v575_v43, 1  ;;  %2979 = vst.msk [vmem:[#allocation3 + $0x68] sm:$0x3] %vm2966_vm7, %v4463_v3  ;;  %2981 = vst.msk [vmem:[#allocation3 + $0x78] sm:$0x3] %vm2966_vm7, %v4463_v3 }
  0x36   : > { %2982 = vst.msk [vmem:[#allocation3 + $0x80] sm:$0xff] %vm2964_vm6, %v4463_v3  ;;  %2984 = vst.msk [vmem:[#allocation3 + $0x90] sm:$0xff] %vm2964_vm6, %v4463_v3 }
  0x37   : > { %v577_v46 = vadd.f32 %v576_v44, %v575_v43  ;;  %2983 = vst.msk [vmem:[#allocation3 + $0x88] sm:$0x3] %vm2966_vm7, %v4463_v3  ;;  %2985 = vst.msk [vmem:[#allocation3 + $0x98] sm:$0x3] %vm2966_vm7, %v4463_v3 }
  0x39   : > { %v579_v48 = vmul.f32 0.015625, %v577_v46 }
  0x3b   : > { %v589_v50 = vsel %vm556_vm1, %v579_v48, 0 }
  0x3c   : > { %v4777_v52 = vand.u32 4294901760, %v589_v50 }
  0x3e   : > { %v4785_v55 = vsub.f32 %v589_v50, %v4777_v52 }
  0x40   : > { %v666_v59 = vand.u32 4294901760, %v4785_v55 }
  0x42   : > { %v667_v63 = vsub.f32 %v4785_v55, %v666_v59  ;;  %3929 = vmatmul.mubr.f32.vlgmr.msra.gmra.mxu1 %v666_v59 }
  0x43   : > { %3951 = vmatpush3.msra.mxu1 %v4632_v4  ;;  %3966 = vmatprep.mubr.msk.f32.mxu1 %vm4464_vm0, %v4463_v3  ;;  %v709_v4 = vand.u32 4294901760, %v708_v2 }
  0x44   : > { %v668_v8 = vand.u32 4294901760, %v667_v63  ;;  %3952 = vmatprep.subr.mxu1 %v4463_v3 }
  0x45   : > { %3953 = vmatpush3.msra.mxu1 %v4635_v5  ;;  %v716_v5 = vand.u32 4294901760, %v715_v17 }
  0x46   : > { %3872 = vmatmul.mubr.f32.vlgmr.msra.gmra.mxu0 %v668_v8  ;;  %3954 = vmatprep.subr.mxu1 %v4463_v3 }
  0x47   : > { %3875 = vmatpush3.msra.mxu0 %v695_v1  ;;  %3890 = vmatprep.mubr.msk.f32.mxu0 %vm4464_vm0, %v4463_v3 }
  0x48   : > { %3876 = vmatprep.subr.mxu0 %v4463_v3  ;;  %3955 = vmatpush3.msra.mxu1 %v4650_v7  ;;  %v736_v7 = vsub.f32 %v4807_v0, %v735_v21 }
  0x49   : > { %3877 = vmatpush3.msra.mxu0 %v702_v16  ;;  %3956 = vmatprep.subr.mxu1 %v4463_v3 }
  0x4a   : > { %3878 = vmatprep.subr.mxu0 %v4463_v3  ;;  %3957 = vmatpush3.msra.mxu1 %v4662_v9  ;;  %v737_v9 = vand.u32 4294901760, %v736_v7 }
  0x4b   : > { %3879 = vmatpush3.msra.mxu0 %v709_v4  ;;  %3958 = vmatprep.subr.mxu1 %v4463_v3 }
  0x4c   : > { %3880 = vmatprep.subr.mxu0 %v4463_v3  ;;  %3959 = vmatpush3.msra.mxu1 %v4688_v14  ;;  %v744_v14 = vand.u32 4294901760, %v743_v32 }
  0x4d   : > { %3881 = vmatpush3.msra.mxu0 %v716_v5  ;;  %3960 = vmatprep.subr.mxu1 %v4463_v3  ;;  %v1134_v5 = vld [vmem:[%s5726_s5] sm:$0x1] }
  0x4e   : > { %3882 = vmatprep.subr.mxu0 %v4463_v3  ;;  %3961 = vmatpush3.msra.mxu1 %v4712_v22  ;;  %v1133_v22 = vld [vmem:[%s5725_s4] sm:$0x3] }
  0x4f   : > { %3883 = vmatpush3.msra.mxu0 %v723_v26  ;;  %3962 = vmatprep.subr.mxu1 %v4463_v3 }
  0x50   : > { %3884 = vmatprep.subr.mxu0 %v4463_v3  ;;  %3963 = vmatpush3.msra.mxu1 %v4728_v27  ;;  %v1141_v27 = vsel %vm1139_vm2, %v1133_v22, 0 }
  0x51   : > { %3885 = vmatpush3.msra.mxu0 %v730_v28  ;;  %3964 = vmatprep.subr.mxu1 %v4463_v3 }
  0x52   : > { %3886 = vmatprep.subr.mxu0 %v4463_v3  ;;  %3965 = vmatpush3.msra.mxu1 %v4735_v29  ;;  %v1174_v29 = vand.u32 4294901760, %v1141_v27 }
  0x53   : > { %3887 = vmatpush3.msra.mxu0 %v737_v9  ;;  %3967 = vmatmul.mubr.f32.vlgmr.msra.gmra.mxu1 %v4777_v52 }
  0x54   : > { %3888 = vmatprep.subr.mxu0 %v4463_v3  ;;  %3974 = vmatprep.subr.mxu1 %v4463_v3  ;;  %v1251_v33 = vsub.f32 %v1141_v27, %v1174_v29 }
  0x55   : > { %3889 = vmatpush3.msra.mxu0 %v744_v14  ;;  %3976 = vmatprep.mubr.msk.f32.mxu1 %vm4464_vm0, %v4463_v3 }
  0x56   : > { %3891 = vmatmul.mubr.f32.vlgmr.msra.gmra.mxu0 %v4777_v52  ;;  %3893 = vmatprep.subr.mxu0 %v4463_v3  ;;  %v1252_v34 = vand.u32 4294901760, %v1251_v33 }
  0x57   : > { %3894 = vmatpush3.msra.mxu0 %v4765_v45  ;;  %3909 = vmatprep.mubr.msk.f32.mxu0 %vm4464_vm0, %v4463_v3 }
  0x58   : > { %3895 = vmatprep.subr.mxu0 %v4463_v3  ;;  %v1253_v35 = vsub.f32 %v1251_v33, %v1252_v34 }
  0x59   : > { %3896 = vmatpush3.msra.mxu0 %v4769_v47 }
  0x5a   : > { %3897 = vmatprep.subr.mxu0 %v4463_v3  ;;  %v1254_v36 = vand.u32 4294901760, %v1253_v35 }
  0x5b   : > { %3898 = vmatpush3.msra.mxu0 %v4773_v49  ;;  %v1595_v49 = vld [vmem:[%s5727_s6] sm:$0x3] }
  0x5c   : > { %3899 = vmatprep.subr.mxu0 %v4463_v3  ;;  %3975 = vmatpush3.msra.mxu1 %v1254_v36 }
  0x5d   : > { %3900 = vmatpush3.msra.mxu0 %v4781_v53  ;;  %3984 = vmatprep.subr.mxu1 %v4463_v3  ;;  %v1598_v53 = vsel %vm1139_vm2, %v1595_v49, 0 }
  0x5e   : > { %3901 = vmatprep.subr.mxu0 %v4463_v3 }
  0x5f   : > { %3902 = vmatpush3.msra.mxu0 %v4789_v56 }
  0x60   : > { %3903 = vmatprep.subr.mxu0 %v4463_v3 }
  0x61   : > { %3904 = vmatpush3.msra.mxu0 %v4798_v60 }
  0x62   : > { %3905 = vmatprep.subr.mxu0 %v4463_v3 }
  0x63   : > { %3906 = vmatpush3.msra.mxu0 %v4807_v0 }
  0x64   : > { %3907 = vmatprep.subr.mxu0 %v4463_v3 }
  0x65   : > { %3908 = vmatpush3.msra.mxu0 %v4819_v10 }
  0x66   : > { %3910 = vmatmul.mubr.f32.vlgmr.msra.gmra.mxu0 %v4785_v55  ;;  %3931 = vmatprep.subr.mxu0 %v4463_v3 }
  0x67   : > { %3932 = vmatpush3.msra.mxu0 %v693_v51  ;;  %3947 = vmatprep.mubr.msk.f32.mxu0 %vm4464_vm0, %v4463_v3 }
  0x68   : > { %3933 = vmatprep.subr.mxu0 %v4463_v3 }
  0x69   : > { %3934 = vmatpush3.msra.mxu0 %v700_v54  ;;  %v1128_v54 = vld [vmem:[%s5764_s2] sm:$0x1] }
  0x6a   : > { %3935 = vmatprep.subr.mxu0 %v4463_v3 }
  0x6b   : > { %3936 = vmatpush3.msra.mxu0 %v707_v58  ;;  %v1631_v58 = vand.u32 4294901760, %v1598_v53 }
  0x6c   : > { %3937 = vmatprep.subr.mxu0 %v4463_v3 }
  0x6d   : > { %3938 = vmatpush3.msra.mxu0 %v714_v62  ;;  %v1708_v61 = vsub.f32 %v1598_v53, %v1631_v58 }
  0x6e   : > { %3939 = vmatprep.subr.mxu0 %v4463_v3 }
  0x6f   : > { %3940 = vmatpush3.msra.mxu0 %v721_v6  ;;  %v1709_v1 = vand.u32 4294901760, %v1708_v61 }
  0x70   : > { %3941 = vmatprep.subr.mxu0 %v4463_v3 }
  0x71   : > { %3942 = vmatpush3.msra.mxu0 %v728_v18  ;;  %v1710_v8 = vsub.f32 %v1708_v61, %v1709_v1 }
  0x72   : > { %3943 = vmatprep.subr.mxu0 %v4463_v3 }
  0x73   : > { %3944 = vmatpush3.msra.mxu0 %v735_v21  ;;  %v1711_v17 = vand.u32 4294901760, %v1710_v8 }
  0x74   : > { %3945 = vmatprep.subr.mxu0 %v4463_v3 }
  0x75   : > { %3946 = vmatpush3.msra.mxu0 %v742_v25 }
  0x76   : > { %3948 = vmatmul.mubr.f32.vlgmr.msra.gmra.mxu0 %v4777_v52  ;;  %3969 = vmatprep.subr.mxu0 %v4463_v3 }
  0x77   : > { %3971 = vmatprep.mubr.msk.f32.mxu0 %vm4464_vm0, %v4463_v3  ;;  %3970 = vmatpush3.msra.mxu0 %v1174_v29 }
  0x78   : > { %3979 = vmatprep.subr.mxu0 %v4463_v3 }
 0x102   : > { %v950_v37 = vpop.f32.mrf.mxu1 }
 0x104   : > { %v3930_v38 = vpop.f32.mrf.mxu1 }
 0x106   : > { %v670_v39 = vpop.f32.mrf.mxu0 }
 0x108   : > { %v3873_v40 = vpop.f32.mrf.mxu0 }
 0x113   : > { %v1124_v41 = vpop.f32.mrf.mxu1 }
 0x115   : > { %v3968_v42 = vpop.f32.mrf.mxu1 }
 0x116   : > { %v781_v43 = vpop.f32.mrf.mxu0 }
 0x117   : > { %v782_v47 = vadd.f32 %v781_v43, %v670_v39  ;;  %v1596_v39 = vld [vmem:[%s5728_s7] sm:$0x1] }
 0x118   : > { %v3892_v44 = vpop.f32.mrf.mxu0 }
 0x126   : > { %v869_v45 = vpop.f32.mrf.mxu0 }
 0x127   : > { %v870_v48 = vadd.f32 %v869_v45, %v782_v47 }
 0x128   : > { %v3911_v46 = vpop.f32.mrf.mxu0 }
 0x129   : > { %v951_v50 = vadd.f32 %v950_v37, %v870_v48 }
 0x136   : > { %v1045_v51 = vpop.f32.mrf.mxu0 }
 0x137   : > { %v1046_v52 = vadd.f32 %v1045_v51, %v951_v50 }
 0x138   : > { %v3949_v55 = vpop.f32.mrf.mxu0 }
 0x139   : > { %v1125_v56 = vadd.f32 %v1124_v41, %v1046_v52 }
 0x13b   : > { %v1129_v59 = vmul.f32 %v1128_v54, %v1125_v56 }
 0x13d   : > { %v1131_v60 = vadd.f32 %v1130_v57, %v1129_v59  ;;  %v2052_v59 = vlaneseq }
 0x13f   : > { %v1132_v62 = vmax.f32 %v1131_v60, 0.0  ;;  %v2053_v60 = vshrl.u32 %v2052_v59, 7 }
 0x141   : > { %v1137_v63 = vsel %vm1135_vm3, %v1132_v62, 0  ;;  %v2054_v62 = vsub.s32 0, %v2053_v60 }
 0x142   : > { %v1209_v0 = vand.u32 4294901760, %v1137_v63 }
 0x144   : > { %v1210_v2 = vsub.f32 %v1137_v63, %v1209_v0  ;;  %3977 = vmatmul.mubr.f32.vlgmr.msra.gmra.mxu1 %v1209_v0 }
 0x145   : > { %3985 = vmatpush3.msra.mxu1 %v1174_v29  ;;  %3986 = vmatprep.mubr.msk.f32.mxu1 %vm4464_vm0, %v4463_v3 }
 0x146   : > { %v1211_v6 = vand.u32 4294901760, %v1210_v2  ;;  %3994 = vmatprep.subr.mxu1 %v4463_v3 }
 0x148   : > { %3987 = vmatmul.mubr.f32.vlgmr.msra.gmra.mxu1 %v1211_v6  ;;  %v1212_v10 = vsub.f32 %v1210_v2, %v1211_v6 }
 0x149   : > { %3995 = vmatpush3.msra.mxu1 %v1174_v29  ;;  %3996 = vmatprep.mubr.msk.f32.mxu1 %vm4464_vm0, %v4463_v3 }
 0x14a   : > { %v1213_v16 = vand.u32 4294901760, %v1212_v10  ;;  %4004 = vmatprep.subr.mxu1 %v4463_v3  ;;  %v4365_v10 = vld [vmem:[%s5729_s8 + $0x80] sm:$0xff]  }
 0x14c   : > { %3972 = vmatmul.mubr.f32.vlgmr.msra.gmra.mxu0 %v1213_v16  ;;  %3997 = vmatmul.mubr.f32.vlgmr.msra.gmra.mxu1 %v1209_v0 }
 0x14d   : > { %3980 = vmatpush3.msra.mxu0 %v1251_v33  ;;  %3981 = vmatprep.mubr.msk.f32.mxu0 %vm4464_vm0, %v4463_v3 }
 0x14e   : > { %3989 = vmatprep.subr.mxu0 %v4463_v3  ;;  %4005 = vmatpush3.msra.mxu1 %v1711_v17 }
 0x14f   : > { %4006 = vmatprep.mubr.msk.f32.mxu1 %vm4464_vm0, %v4463_v3  ;;  %4014 = vmatprep.subr.mxu1 %v4463_v3 }
 0x150   : > { %3982 = vmatmul.mubr.f32.vlgmr.msra.gmra.mxu0 %v1210_v2  ;;  %4007 = vmatmul.mubr.f32.vlgmr.msra.gmra.mxu1 %v1209_v0 }
 0x151   : > { %3990 = vmatpush3.msra.mxu0 %v1252_v34  ;;  %3991 = vmatprep.mubr.msk.f32.mxu0 %vm4464_vm0, %v4463_v3 }
 0x152   : > { %4015 = vmatpush3.msra.mxu1 %v1631_v58  ;;  %4016 = vmatprep.mubr.msk.f32.mxu1 %vm4464_vm0, %v4463_v3 }
 0x153   : > { %3999 = vmatprep.subr.mxu0 %v4463_v3  ;;  %4024 = vmatprep.subr.mxu1 %v4463_v3 }
 0x154   : > { %3992 = vmatmul.mubr.f32.vlgmr.msra.gmra.mxu0 %v1209_v0  ;;  %4017 = vmatmul.mubr.f32.vlgmr.msra.gmra.mxu1 %v1211_v6 }
 0x155   : > { %4000 = vmatpush3.msra.mxu0 %v1631_v58  ;;  %4001 = vmatprep.mubr.msk.f32.mxu0 %vm4464_vm0, %v4463_v3 }
 0x156   : > { %4025 = vmatpush3.msra.mxu1 %v1631_v58  ;;  %4026 = vmatprep.mubr.msk.f32.mxu1 %vm4464_vm0, %v4463_v3 }
 0x157   : > { %4009 = vmatprep.subr.mxu0 %v4463_v3 }
 0x158   : > { %4002 = vmatmul.mubr.f32.vlgmr.msra.gmra.mxu0 %v1213_v16  ;;  %4027 = vmatmul.mubr.f32.vlgmr.msra.gmra.mxu1 %v1209_v0 }
 0x159   : > { %4010 = vmatpush3.msra.mxu0 %v1708_v61  ;;  %4011 = vmatprep.mubr.msk.f32.mxu0 %vm4464_vm0, %v4463_v3 }
 0x15a   : > { %4019 = vmatprep.subr.mxu0 %v4463_v3 }
 0x15c   : > { %4012 = vmatmul.mubr.f32.vlgmr.msra.gmra.mxu0 %v1210_v2 }
 0x15d   : > { %4020 = vmatpush3.msra.mxu0 %v1709_v1  ;;  %4021 = vmatprep.mubr.msk.f32.mxu0 %vm4464_vm0, %v4463_v3  ;;  %v4364_v1 = vld [vmem:[%s5729_s8 + $0x88] sm:$0xff]   ;;  %v4369_v3 = vld [vmem:[%s5735_s14 + $0x30] sm:$0xff]  }
 0x15e   : > { %4029 = vmatprep.subr.bf16.mxu1 %v4364_v1 }
 0x15f   : > { %4030 = vmatpush3.bf16.msra.mxu1 %v4364_v1 }
 0x160   : > { %4022 = vmatmul.mubr.f32.vlgmr.msra.gmra.mxu0 %v1209_v0  ;;  %4031 = vmatprep.subr.bf16.mxu1 %v4365_v10 }
 0x163   : > { %4032 = vmatpush3.bf16.msra.mxu1 %v4365_v10 }
 0x204   : > { %v1291_v18 = vpop.f32.mrf.mxu1 }
 0x206   : > { %v3978_v4 = vpop.f32.mrf.mxu1 }
 0x208   : > { %v1439_v19 = vpop.f32.mrf.mxu1 }
 0x20a   : > { %v3988_v21 = vpop.f32.mrf.mxu1 }
 0x20c   : > { %v1215_v23 = vpop.f32.mrf.mxu0  ;;  %v1585_v25 = vpop.f32.mrf.mxu1 }
 0x20d   : > { %v1216_v26 = vadd.f32 %v1215_v23, %v1134_v5 }
 0x20e   : > { %v3973_v7 = vpop.f32.mrf.mxu0  ;;  %v3998_v28 = vpop.f32.mrf.mxu1 }
 0x20f   : > { %v1292_v32 = vadd.f32 %v1291_v18, %v1216_v26  ;;  %v5022_v18 = vld [vmem:[%s5732_s11 + $0x8] sm:$0xff]  }
 0x210   : > { %v1365_v9 = vpop.f32.mrf.mxu0  ;;  %v1748_v14 = vpop.f32.mrf.mxu1  ;;  %4041 = vmatprep.subr.bf16.mxu1 %v5022_v18 }
 0x211   : > { %v1366_v22 = vadd.f32 %v1365_v9, %v1292_v32 }
 0x212   : > { %v3983_v27 = vpop.f32.mrf.mxu0  ;;  %v4008_v29 = vpop.f32.mrf.mxu1 }
 0x213   : > { %v1440_v33 = vadd.f32 %v1439_v19, %v1366_v22 }
 0x214   : > { %v1513_v34 = vpop.f32.mrf.mxu0  ;;  %v1896_v35 = vpop.f32.mrf.mxu1 }
 0x215   : > { %v1514_v36 = vadd.f32 %v1513_v34, %v1440_v33 }
 0x216   : > { %v3993_v37 = vpop.f32.mrf.mxu0  ;;  %v4018_v38 = vpop.f32.mrf.mxu1 }
 0x217   : > { %v1586_v40 = vadd.f32 %v1585_v25, %v1514_v36 }
 0x218   : > { %v1672_v41 = vpop.f32.mrf.mxu0  ;;  %v2042_v42 = vpop.f32.mrf.mxu1 }
 0x219   : > { %v3669_v43 = vmul.f32 -1.442695, %v1586_v40  ;;  %v1673_v44 = vadd.f32 %v1672_v41, %v1596_v39 }
 0x21a   : > { %v4003_v45 = vpop.f32.mrf.mxu0  ;;  %v4028_v46 = vpop.f32.mrf.mxu1 }
 0x21b   : > { %4393 = vpow2.f32 %v3669_v43  ;;  %v1749_v47 = vadd.f32 %v1748_v14, %v1673_v44 }
 0x21c   : > { %v1822_v48 = vpop.f32.mrf.mxu0 }
 0x21d   : > { %v1823_v49 = vadd.f32 %v1822_v48, %v1749_v47  ;;  %v4367_v48 = vld [vmem:[%s5732_s11] sm:$0xff]  }
 0x21e   : > { %v4013_v50 = vpop.f32.mrf.mxu0 }
 0x21f   : > { %v1897_v51 = vadd.f32 %v1896_v35, %v1823_v49 }
 0x220   : > { %v1970_v52 = vpop.f32.mrf.mxu0 }
 0x221   : > { %v1971_v53 = vadd.f32 %v1970_v52, %v1897_v51 }
 0x222   : > { %v4023_v54 = vpop.f32.mrf.mxu0 }
 0x223   : > { %v2043_v55 = vadd.f32 %v2042_v42, %v1971_v53 }
 0x225   : > { %v3670_v56 = vmul.f32 -1.442695, %v2043_v55 }
 0x227   : > { %4395 = vpow2.f32 %v3670_v56 }
 0x228   : > { %v4394_v57 = vpop.eup %4393 }
 0x229   : > { %v1592_v58 = vadd.f32 1.0, %v4394_v57  ;;  %v2259_v57 = vld [vmem:[#allocation2 + $0x92] sm:$0xff] }
 0x22b   : > { %4397 = vrcp.f32 %v1592_v58 }
 0x234   : > { %v4396_v61 = vpop.eup %4395 }
 0x235   : > { %v2049_v63 = vadd.f32 1.0, %v4396_v61 }
 0x237   : > { %4399 = vrcp.f32 %v2049_v63 }
 0x238   : > { %v4398_v0 = vpop.eup %4397 }
 0x239   : > { %v2055_v2 = vrot.slane %v4398_v0, %v2054_v62 }
 0x23b   : > { %v2059_v6 = vmul.f32 %v2055_v2, %v4691_v15  ;;  %v2057_v8 = vmul.f32 %v2055_v2, %v4680_v12  ;;  %v2060_v16 = vmul.f32 %v2055_v2, %v4707_v20  ;;  %v2058_v17 = vmul.f32 %v2055_v2, %v4683_v13 }
 0x23c   : > { %v2062_v4 = vmul.f32 %v2055_v2, %v4738_v30  ;;  %v2061_v19 = vmul.f32 %v2055_v2, %v4720_v24  ;;  %v2063_v23 = vmul.f32 %v2055_v2, %v4741_v31 }
 0x23d   : > { %2078 = vrot.lane.b32.xlu1 %v2059_v6, %s4465_s26  ;;  %2074 = vrot.lane.b32.xlu0 %v2057_v8, %s4465_s26 }
 0x241   : > { %2080 = vrot.lane.b32.xlu1 %v2060_v16, %s4465_s26  ;;  %2076 = vrot.lane.b32.xlu0 %v2058_v17, %s4465_s26 }
 0x244   : > { %v4400_v21 = vpop.eup %4399 }
 0x245   : > { %v2107_v5 = vrot.slane %v4400_v21, %v2054_v62  ;;  %2084 = vrot.lane.b32.xlu1 %v2062_v4, %s4465_s26  ;;  %2082 = vrot.lane.b32.xlu0 %v2061_v19, %s4465_s26 }
 0x247   : > { %v5031_v25 = vmul.f32 %v2107_v5, %v4677_v11  ;;  %v2109_v26 = vmul.f32 %v2107_v5, %v4680_v12  ;;  %v5038_v7 = vmul.f32 %v2107_v5, %v4683_v13  ;;  %v5044_v28 = vmul.f32 %v2107_v5, %v4691_v15 }
 0x248   : > { %v5047_v32 = vmul.f32 %v2107_v5, %v4707_v20  ;;  %v5054_v12 = vmul.f32 %v2107_v5, %v4720_v24  ;;  %v5057_v13 = vmul.f32 %v2107_v5, %v4738_v30  ;;  %v5064_v15 = vmul.f32 %v2107_v5, %v4741_v31 }
 0x249   : > { %2086 = vrot.lane.b32.xlu0 %v2063_v23, %s4465_s26  ;;  %2124 = vrot.lane.b32.xlu1 %v5031_v25, %s4465_s26  ;;  %v5067_v20 = vmul.f32 %v2055_v2, %v4677_v11 }
 0x24d   : > { %2126 = vrot.lane.b32.xlu0 %v2109_v26, %s4465_s26  ;;  %2128 = vrot.lane.b32.xlu1 %v5038_v7, %s4465_s26 }
 0x251   : > { %2130 = vrot.lane.b32.xlu0 %v5044_v28, %s4465_s26  ;;  %2132 = vrot.lane.b32.xlu1 %v5047_v32, %s4465_s26 }
 0x255   : > { %2134 = vrot.lane.b32.xlu0 %v5054_v12, %s4465_s26  ;;  %2136 = vrot.lane.b32.xlu1 %v5057_v13, %s4465_s26 }
 0x259   : > { %2138 = vrot.lane.b32.xlu0 %v5064_v15, %s4465_s26  ;;  %2072 = vrot.lane.b32.xlu1 %v5067_v20, %s4465_s26 }
 0x2af   : > { %v2079_v24 = vpop.permute.xlu1 %2078  ;;  %v2075_v30 = vpop.permute.xlu0 %2074 }
 0x2b0   : > { %v2099_v9 = vadd.f32 %v2079_v24, %v2059_v6  ;;  %v2097_v14 = vadd.f32 %v2075_v30, %v2057_v8  ;;  %v4370_v30 = vld [vmem:[%s5735_s14 + $0x28] sm:$0xff]  }
 0x2b2   : > { %2182 = vst.msk [vmem:[#allocation2 + $0x41] sm:$0xff] %vm2156_vm4, %v2099_v9  ;;  %2180 = vst.msk [vmem:[#allocation2 + $0x21] sm:$0xff] %vm2156_vm4, %v2097_v14  ;;  %v3701_v14 = vld [vmem:[%s5733_s12] ss:$0 sm:$0xff] }
 0x2b3   : > { %v2081_v22 = vpop.permute.xlu1 %2080  ;;  %v2077_v31 = vpop.permute.xlu0 %2076 }
 0x2b4   : > { %v2100_v27 = vadd.f32 %v2081_v22, %v2060_v16  ;;  %v2098_v29 = vadd.f32 %v2077_v31, %v2058_v17  ;;  %v3702_v31 = vld [vmem:[%s5734_s13] ss:$0 sm:$0xff] }
 0x2b6   : > { %2183 = vst.msk [vmem:[#allocation2 + $0x51] sm:$0xff] %vm2156_vm4, %v2100_v27  ;;  %2181 = vst.msk [vmem:[#allocation2 + $0x31] sm:$0xff] %vm2156_vm4, %v2098_v29  ;;  %v4371_v29 = vld [vmem:[%s5735_s14 + $0x20] sm:$0xff]  }
 0x2b7   : > { %v2085_v11 = vpop.permute.xlu1 %2084  ;;  %v2083_v33 = vpop.permute.xlu0 %2082 }
 0x2b8   : > { %v2102_v34 = vadd.f32 %v2085_v11, %v2062_v4  ;;  %v2101_v35 = vadd.f32 %v2083_v33, %v2061_v19 }
 0x2b9   : > { %v5079_v39 = vld [vmem:[#allocation2 + $0x22] sm:$0xff] }
 0x2ba   : > { %2185 = vst.msk [vmem:[#allocation2 + $0x71] sm:$0xff] %vm2156_vm4, %v2102_v34  ;;  %2184 = vst.msk [vmem:[#allocation2 + $0x61] sm:$0xff] %vm2156_vm4, %v2101_v35  ;;  %v5083_v41 = vld [vmem:[#allocation2 + $0x42] sm:$0xff] }
 0x2bb   : > { %v2087_v36 = vpop.permute.xlu0 %2086  ;;  %v2125_v37 = vpop.permute.xlu1 %2124 }
 0x2bc   : > { %v2103_v38 = vadd.f32 %v2087_v36, %v2063_v23  ;;  %v2148_v61 = vadd.f32 %v2125_v37, %v5031_v25 }
 0x2bd   : > { %v5081_v40 = vld [vmem:[#allocation2 + $0x32] sm:$0xff] }
 0x2be   : > { %v5085_v42 = vld [vmem:[#allocation2 + $0x52] sm:$0xff]  ;;  %2186 = vst.msk [vmem:[#allocation2 + $0x81] sm:$0xff] %vm2156_vm4, %v2103_v38  ;;  %v2503_v43 = vpack.c.bf16 %v5081_v40, %v5079_v39  ;;  %v4274_v45 = vpack.i.bf16 %v5083_v41, %v5081_v40  ;;  %v4289_v49 = vpack.i.bf16 %v5081_v40, %v5079_v39 }
 0x2bf   : > { %v2506_v44 = vpack.c.bf16 %v5085_v42, %v5083_v41  ;;  %v2127_v46 = vpop.permute.xlu0 %2126  ;;  %v2129_v47 = vpop.permute.xlu1 %2128  ;;  %v4319_v50 = vpack.i.bf16 %v5085_v42, %v5083_v41 }
 0x2c0   : > { %4033 = vmatprep.mubr.msk.bf16.mxu1 %vm2156_vm4, %v2503_v43  ;;  %v2149_v59 = vadd.f32 %v2127_v46, %v2109_v26  ;;  %v2150_v17 = vadd.f32 %v2129_v47, %v5038_v7 }
 0x2c1   : > { %4034 = vmatmul.mubr.msk.bf16.vlgmr.msra.gmra.mxu1 %vm2156_vm4, %v2506_v44  ;;  %v5103_v51 = vld [vmem:[#allocation2 + $0x62] sm:$0xff]  ;;  %v5105_v52 = vld [vmem:[#allocation2 + $0x72] sm:$0xff] }
 0x2c2   : > { %4042 = vmatpush3.bf16.msra.mxu1 %v5022_v18  ;;  %v2509_v53 = vpack.c.bf16 %v5105_v52, %v5103_v51  ;;  %v4304_v54 = vpack.i.bf16 %v5103_v51, %v5085_v42  ;;  %v4349_v58 = vpack.i.bf16 %v5105_v52, %v5103_v51  ;;  %v2829_v1 = vpack.c.bf16 %v2149_v59, %v2148_v61  ;;  %v5430_v40 = vld [vmem:[#allocation2 + $0x61] sm:$0xff] }
 0x2c3   : > { %v2131_v55 = vpop.permute.xlu0 %2130  ;;  %v2133_v56 = vpop.permute.xlu1 %2132  ;;  %4043 = vmatprep.subr.bf16.mxu1 %v4367_v48 }
 0x2c4   : > { %4037 = vmatprep.mubr.msk.bf16.mxu1 %vm2156_vm4, %v2509_v53  ;;  %v2151_v6 = vadd.f32 %v2131_v55, %v5044_v28  ;;  %v2152_v18 = vadd.f32 %v2133_v56, %v5047_v32 }
 0x2c5   : > { %v5115_v60 = vld [vmem:[#allocation2 + $0x82] sm:$0xff] }
 0x2c6   : > { %v2512_v62 = vpack.c.bf16 %v2259_v57, %v5115_v60  ;;  %4044 = vmatpush3.bf16.msra.mxu1 %v4367_v48  ;;  %v4334_v63 = vpack.i.bf16 %v5115_v60, %v5105_v52  ;;  %v2830_v4 = vpack.c.bf16 %v2151_v6, %v2150_v17  ;;  %v4372_v57 = vld [vmem:[%s5735_s14 + $0x18] sm:$0xff]   ;;  %v3011_v17 = vld [vmem:[#allocation3 + $0x2] sm:$0xff] }
 0x2c7   : > { %v2137_v0 = vpop.permute.xlu1 %2136  ;;  %v2135_v2 = vpop.permute.xlu0 %2134  ;;  %v5450_v42 = vld [vmem:[#allocation2 + $0x81] sm:$0xff] }
 0x2c8   : > { %v2153_v10 = vadd.f32 %v2135_v2, %v5054_v12  ;;  %v2154_v23 = vadd.f32 %v2137_v0, %v5057_v13  ;;  %v4368_v12 = vld [vmem:[%s5735_s14 + $0x38] sm:$0xff]  }
 0x2c9   : > { %4038 = vmatmul.mubr.msk.bf16.gmra.mxu1 %vm2156_vm4, %v2512_v62 }
 0x2ca   : > { %4045 = vmatprep.mubr.msk.bf16.mxu1 %vm2156_vm4, %v2829_v1  ;;  %v2831_v19 = vpack.c.bf16 %v2153_v10, %v2152_v18  ;;  %v4373_v1 = vld [vmem:[%s5735_s14 + $0x10] sm:$0xff]   ;;  %v3003_v18 = vld [vmem:[#allocation3 + $0x1] sm:$0xff] }
 0x2cb   : > { %v2073_v8 = vpop.permute.xlu1 %2072  ;;  %v2139_v21 = vpop.permute.xlu0 %2138 }
 0x2cc   : > { %v2096_v16 = vadd.f32 %v2073_v8, %v5067_v20  ;;  %v2155_v5 = vadd.f32 %v2139_v21, %v5064_v15  ;;  %v4466_v15 = vmov 0  }
 0x2cd   : > { %3443 = vmatprep.subr.bf16.mxu1 %v4466_v15 }
 0x2ce   : > { %2179 = vst.msk [vmem:[#allocation2 + $0x11] sm:$0xff] %vm2156_vm4, %v2096_v16  ;;  %v2832_v25 = vpack.c.bf16 %v2155_v5, %v2154_v23 }
 0x2d1   : > { %4046 = vmatmul.mubr.msk.bf16.vlgmr.msra.gmra.mxu1 %vm2156_vm4, %v2830_v4 }
 0x2d2   : > { %4049 = vmatprep.mubr.msk.bf16.mxu1 %vm2156_vm4, %v2831_v19  ;;  %3444 = vmatpush1.bf16.msra.mxu1 %v4368_v12 }
 0x2d3   : > { %3445 = vmatprep.subr.bf16.mxu1 %v4466_v15 }
 0x2d6   : > { %3446 = vmatpush1.bf16.msra.mxu1 %v4369_v3 }
 0x2d7   : > { %3447 = vmatprep.subr.bf16.mxu1 %v4466_v15 }
 0x2d9   : > { %4050 = vmatmul.mubr.msk.bf16.gmra.mxu1 %vm2156_vm4, %v2832_v25 }
 0x2da   : > { %3448 = vmatpush1.bf16.msra.mxu1 %v4370_v30 }
 0x2db   : > { %3449 = vmatprep.subr.bf16.mxu1 %v4466_v15 }
 0x2de   : > { %3450 = vmatpush1.bf16.msra.mxu1 %v4371_v29 }
 0x2df   : > { %3451 = vmatprep.subr.bf16.mxu1 %v4466_v15 }
 0x2e2   : > { %3452 = vmatpush1.bf16.msra.mxu1 %v4372_v57 }
 0x2e3   : > { %3453 = vmatprep.subr.bf16.mxu1 %v4466_v15 }
 0x2e6   : > { %3454 = vmatpush1.bf16.msra.mxu1 %v4373_v1 }
 0x2e7   : > { %3455 = vmatprep.subr.bf16.mxu1 %v4466_v15 }
 0x381   : > { %v5174_v26 = vpop.f32.mrf.mxu1 }
 0x383   : > { %v5176_v7 = vpop.f32.mrf.mxu1 }
 0x385   : > { %v5178_v28 = vpop.f32.mrf.mxu1 }
 0x387   : > { %v5180_v32 = vpop.f32.mrf.mxu1 }
 0x389   : > { %v5185_v13 = vpop.f32.mrf.mxu1 }
 0x38b   : > { %v5191_v20 = vpop.f32.mrf.mxu1 }
 0x38d   : > { %v5194_v24 = vpop.f32.mrf.mxu1 }
 0x38f   : > { %v5199_v9 = vpop.f32.mrf.mxu1 }
 0x391   : > { %v4047_v22 = vpop.f32.mrf.mxu1 }
 0x392   : > { %v2935_v27 = vmul.f32 %v4047_v22, %v3701_v14  ;;  %v4374_v22 = vld [vmem:[%s5735_s14 + $0x8] sm:$0xff]  }
 0x393   : > { %v2895_v11 = vpop.f32.mrf.mxu1  ;;  %3456 = vmatpush1.bf16.msra.mxu1 %v4374_v22  ;;  %v4380_v22 = vld [vmem:[%s5729_s8 + $0x30] sm:$0xff]  }
 0x394   : > { %v2950_v33 = vadd.f32 %v3702_v31, %v2935_v27  ;;  %v2933_v34 = vmul.f32 %v3701_v14, %v2895_v11  ;;  %3457 = vmatprep.subr.bf16.mxu1 %v4466_v15 }
 0x395   : > { %v4048_v35 = vpop.f32.mrf.mxu1 }
 0x396   : > { %v2958_v36 = vmax.f32 %v2950_v33, 0.0  ;;  %v2948_v37 = vadd.f32 %v3702_v31, %v2933_v34  ;;  %v2936_v38 = vmul.f32 %v4048_v35, %v3701_v14 }
 0x397   : > { %v2898_v43 = vpop.f32.mrf.mxu1 }
 0x398   : > { %2989 = vst.msk [vmem:[#allocation3 + $0x31] sm:$0xff] %vm2964_vm6, %v2958_v36  ;;  %v2956_v44 = vmax.f32 %v2948_v37, 0.0  ;;  %v2951_v46 = vadd.f32 %v3702_v31, %v2936_v38  ;;  %v2934_v47 = vmul.f32 %v3701_v14, %v2898_v43  ;;  %v4375_v38 = vld [vmem:[%s5735_s14] sm:$0xff]  }
 0x399   : > { %v4051_v48 = vpop.f32.mrf.mxu1  ;;  %3458 = vmatpush1.bf16.msra.mxu1 %v4375_v38 }
 0x39a   : > { %2987 = vst.msk [vmem:[#allocation3 + $0x11] sm:$0xff] %vm2964_vm6, %v2956_v44  ;;  %v2959_v53 = vmax.f32 %v2951_v46, 0.0  ;;  %v2949_v55 = vadd.f32 %v3702_v31, %v2934_v47  ;;  %v2939_v56 = vmul.f32 %v4051_v48, %v3701_v14  ;;  %3473 = vmatprep.subr.bf16.mxu1 %v4466_v15 }
 0x39b   : > { %v2911_v59 = vpop.f32.mrf.mxu1 }
 0x39c   : > { %2990 = vst.msk [vmem:[#allocation3 + $0x41] sm:$0xff] %vm2964_vm6, %v2959_v53  ;;  %v2957_v61 = vmax.f32 %v2949_v55, 0.0  ;;  %v2954_v62 = vadd.f32 %v3702_v31, %v2939_v56  ;;  %v2937_v0 = vmul.f32 %v3701_v14, %v2911_v59  ;;  %v4376_v55 = vld [vmem:[%s5735_s14 + $0x40] sm:$0xff]  }
 0x39d   : > { %v4052_v2 = vpop.f32.mrf.mxu1  ;;  %3474 = vmatpush2.bf16.msra.mxu1 %v4376_v55  ;;  %v4386_v55 = vld [vmem:[%s5729_s8 + $0x18] sm:$0xff]  }
 0x39e   : > { %2988 = vst.msk [vmem:[#allocation3 + $0x21] sm:$0xff] %vm2964_vm6, %v2957_v61  ;;  %v2962_v6 = vmax.f32 %v2954_v62, 0.0  ;;  %v2952_v8 = vadd.f32 %v3702_v31, %v2937_v0  ;;  %v2940_v10 = vmul.f32 %v4052_v2, %v3701_v14 }
 0x39f   : > { %v2914_v16 = vpop.f32.mrf.mxu1  ;;  %v3029_v11 = vld [vmem:[#allocation3 + $0x31] sm:$0xff] }
 0x3a0   : > { %2993 = vst.msk [vmem:[#allocation3 + $0x71] sm:$0xff] %vm2964_vm6, %v2962_v6  ;;  %v2960_v4 = vmax.f32 %v2952_v8, 0.0  ;;  %v2955_v19 = vadd.f32 %v3702_v31, %v2940_v10  ;;  %v2938_v21 = vmul.f32 %v3701_v14, %v2914_v16  ;;  %v3061_v34 = vld [vmem:[#allocation3 + $0x32] sm:$0xff] }
 0x3a1   : > { %v3012_v5 = vld [vmem:[#allocation3 + $0x12] sm:$0xff] }
 0x3a2   : > { %v3004_v23 = vld [vmem:[#allocation3 + $0x11] sm:$0xff]  ;;  %2991 = vst.msk [vmem:[#allocation3 + $0x51] sm:$0xff] %vm2964_vm6, %v2960_v4  ;;  %v2963_v25 = vmax.f32 %v2955_v19, 0.0  ;;  %v2953_v12 = vadd.f32 %v3702_v31, %v2938_v21  ;;  %v4109_v3 = vpack.i.bf16 %v3012_v5, %v3011_v17 }
 0x3a3   : > { %v4104_v30 = vpack.i.bf16 %v3004_v23, %v3003_v18  ;;  %v3030_v27 = vld [vmem:[#allocation3 + $0x41] sm:$0xff]  ;;  %v5235_v31 = vld [vmem:[#allocation3 + $0x30] sm:$0xff]  ;;  %v4377_v18 = vld [vmem:[%s5729_s8 + $0x78] sm:$0xff]  }
 0x3a4   : > { %v5230_v29 = vld [vmem:[#allocation3 + $0x40] sm:$0xff]  ;;  %2994 = vst.msk [vmem:[#allocation3 + $0x81] sm:$0xff] %vm2964_vm6, %v2963_v25  ;;  %v2961_v14 = vmax.f32 %v2953_v12, 0.0  ;;  %4110 = vrot.lane.b32.xlu1 %v4109_v3, %s5747_s29  ;;  %v4119_v35 = vpack.i.bf16 %v3030_v27, %v3029_v11  ;;  %v5251_v46 = vld [vmem:[#allocation3 + $0x10] sm:$0xff]  ;;  %v4378_v19 = vld [vmem:[%s5729_s8 + $0x38] sm:$0xff]   ;;  %3803 = vmatprep.subr.bf16.mxu0 %v4377_v18 }
 0x3a5   : > { %4105 = vrot.lane.b32.xlu0 %v4104_v30, %s5749_s30  ;;  %v3060_v33 = vld [vmem:[#allocation3 + $0x22] sm:$0xff]  ;;  %v4114_v36 = vpack.i.bf16 %v5230_v29, %v5235_v31  ;;  %3804 = vmatpush3.bf16.msra.mxu0 %v4378_v19  ;;  %v4379_v12 = vld [vmem:[%s5729_s8 + $0x70] sm:$0xff]  }
 0x3a6   : > { %2992 = vst.msk [vmem:[#allocation3 + $0x61] sm:$0xff] %vm2964_vm6, %v2961_v14  ;;  %v3352_v37 = vpack.c.bf16 %v3061_v34, %v3060_v33  ;;  %v5244_v43 = vld [vmem:[#allocation3 + $0x42] sm:$0xff]  ;;  %v4139_v62 = vpack.i.bf16 %v3060_v33, %v3012_v5  ;;  %v4159_v6 = vpack.i.bf16 %v3061_v34, %v3060_v33  ;;  %3805 = vmatprep.subr.bf16.mxu0 %v4379_v12 }
 0x3a7   : > { %v5246_v44 = vld [vmem:[#allocation3 + $0x20] sm:$0xff]  ;;  %v4124_v48 = vpack.i.bf16 %v5244_v43, %v3061_v34  ;;  %v5268_v0 = vld [vmem:[#allocation3 + $0x72] sm:$0xff]  ;;  %v4382_v33 = vld [vmem:[%s5729_s8 + $0x28] sm:$0xff]  }
 0x3a8   : > { %4115 = vrot.lane.b32.xlu1 %v4114_v36, %s4470_s0  ;;  %3712 = vmatprep.mubr.msk.bf16.mxu1 %vm2964_vm6, %v3352_v37  ;;  %v4129_v53 = vpack.i.bf16 %v5246_v44, %v5251_v46  ;;  %v3028_v57 = vld [vmem:[#allocation3 + $0x21] sm:$0xff]  ;;  %v4144_v1 = vpack.i.bf16 %v5235_v31, %v5246_v44  ;;  %v5296_v25 = vld [vmem:[#allocation3 + $0x70] sm:$0xff] }
 0x3a9   : > { %4120 = vrot.lane.b32.xlu0 %v4119_v35, %s5750_s22  ;;  %v5253_v47 = vld [vmem:[#allocation3 + $0x52] sm:$0xff]  ;;  %v4134_v61 = vpack.i.bf16 %v3028_v57, %v3004_v23  ;;  %v4149_v2 = vpack.i.bf16 %v3029_v11, %v3028_v57  ;;  %3806 = vmatpush3.bf16.msra.mxu0 %v4380_v22  ;;  %v4381_v11 = vld [vmem:[%s5729_s8 + $0x68] sm:$0xff]   ;;  %v4383_v36 = vld [vmem:[%s5729_s8 + $0x60] sm:$0xff]  }
 0x3aa   : > { %v3354_v56 = vpack.c.bf16 %v5253_v47, %v5244_v43  ;;  %v3055_v8 = vld [vmem:[#allocation3 + $0x51] sm:$0xff]  ;;  %v4179_v4 = vpack.i.bf16 %v5253_v47, %v5244_v43  ;;  %3807 = vmatprep.subr.bf16.mxu0 %v4381_v11  ;;  %v4390_v18 = vld [vmem:[%s5729_s8 + $0x8] sm:$0xff]  }
 0x3ab   : > { %v5278_v10 = vld [vmem:[#allocation3 + $0x50] sm:$0xff]  ;;  %v4169_v16 = vpack.i.bf16 %v3055_v8, %v3030_v27  ;;  %v3034_v21 = vld [vmem:[#allocation3 + $0x81] sm:$0xff] }
 0x3ac   : > { %4125 = vrot.lane.b32.xlu1 %v4124_v48, %s5745_s24  ;;  %v4164_v17 = vpack.i.bf16 %v5278_v10, %v5230_v29  ;;  %v3026_v5 = vld [vmem:[#allocation3 + $0x80] sm:$0xff]  ;;  %v3033_v23 = vld [vmem:[#allocation3 + $0x71] sm:$0xff] }
 0x3ad   : > { %4130 = vrot.lane.b32.xlu0 %v4129_v53, %s4470_s0  ;;  %v5266_v59 = vld [vmem:[#allocation3 + $0x62] sm:$0xff]  ;;  %v4189_v3 = vpack.i.bf16 %v3034_v21, %v3033_v23  ;;  %v4184_v30 = vpack.i.bf16 %v3026_v5, %v5296_v25  ;;  %3808 = vmatpush3.bf16.msra.mxu0 %v4382_v33  ;;  %v4385_v53 = vld [vmem:[%s5729_s8 + $0x58] sm:$0xff]  }
 0x3ae   : > { %v3356_v15 = vpack.c.bf16 %v5268_v0, %v5266_v59  ;;  %v3032_v27 = vld [vmem:[#allocation3 + $0x61] sm:$0xff]  ;;  %v4204_v38 = vpack.i.bf16 %v5266_v59, %v5253_v47  ;;  %3809 = vmatprep.subr.bf16.mxu0 %v4383_v36  ;;  %v5379_v36 = vld [vmem:[#allocation2 + $0x31] sm:$0xff] }
 0x3af   : > { %v5305_v14 = vld [vmem:[#allocation3 + $0x60] sm:$0xff]  ;;  %v4199_v34 = vpack.i.bf16 %v3032_v27, %v3055_v8  ;;  %v4214_v57 = vpack.i.bf16 %v3033_v23, %v3032_v27  ;;  %v3051_v8 = vld [vmem:[#allocation3 + $0x90] sm:$0xff] }
 0x3b0   : > { %4135 = vrot.lane.b32.xlu1 %v4134_v61, %s5750_s22  ;;  %v4194_v35 = vpack.i.bf16 %v5305_v14, %v5278_v10  ;;  %v4209_v37 = vpack.i.bf16 %v5296_v25, %v5305_v14  ;;  %v4384_v48 = vld [vmem:[%s5729_s8 + $0x20] sm:$0xff]   ;;  %v2227_v23 = vld [vmem:[#allocation2 + $0x12] sm:$0xff] }
 0x3b1   : > { %4140 = vrot.lane.b32.xlu0 %v4139_v62, %s5745_s24  ;;  %3810 = vmatpush3.bf16.msra.mxu0 %v4384_v48  ;;  %v5337_v61 = vld [vmem:[#allocation3 + $0x82] sm:$0xff]  ;;  %v4387_v62 = vld [vmem:[%s5729_s8 + $0x50] sm:$0xff]   ;;  %s5767_s24 = smov 32   ;;  %v4244_v22 = vpack.i.bf16 %v5079_v39, %v2227_v23 }
 0x3b2   : > { %3811 = vmatprep.subr.bf16.mxu0 %v4385_v53  ;;  %v2195_v12 = vld [vmem:[#allocation2 + $0x1] sm:$0xff] }
 0x3b3   : > { %v2203_v11 = vld [vmem:[#allocation2 + $0x2] sm:$0xff] }
 0x3b4   : > { %4145 = vrot.lane.b32.xlu1 %v4144_v1, %s4465_s26  ;;  %v4229_v1 = vpack.i.bf16 %v5268_v0, %v5266_v59  ;;  %v5375_v33 = vld [vmem:[#allocation2 + $0x20] sm:$0xff] }
 0x3b5   : > { %4150 = vrot.lane.b32.xlu0 %v4149_v2, %s4472_s18  ;;  %3812 = vmatpush3.bf16.msra.mxu0 %v4386_v55  ;;  %v5393_v55 = vld [vmem:[#allocation2 + $0x50] sm:$0xff] }
 0x3b6   : > { %3813 = vmatprep.subr.bf16.mxu0 %v4387_v62 }
 0x3b8   : > { %4155 = vrot.lane.b32.xlu1 %v4149_v2, %s5749_s30  ;;  %v4224_v2 = vpack.i.bf16 %v5337_v61, %v5268_v0 }
 0x3b9   : > { %4160 = vrot.lane.b32.xlu0 %v4159_v6, %s5747_s29  ;;  %v4388_v6 = vld [vmem:[%s5729_s8 + $0x10] sm:$0xff]  }
 0x3ba   : > { %3814 = vmatpush3.bf16.msra.mxu0 %v4388_v6 }
 0x3bc   : > { %4170 = vrot.lane.b32.xlu1 %v4169_v16, %s4472_s18 }
 0x3bd   : > { %4165 = vrot.lane.b32.xlu0 %v4164_v17, %s4465_s26  ;;  %v4389_v17 = vld [vmem:[%s5729_s8 + $0x48] sm:$0xff]  }
 0x3be   : > { %3815 = vmatprep.subr.bf16.mxu0 %v4389_v17 }
 0x3bf   : > { %3816 = vmatpush3.bf16.msra.mxu0 %v4390_v18  ;;  %v2242_v18 = vld [vmem:[#allocation2 + $0x80] sm:$0xff] }
 0x3c0   : > { %4180 = vrot.lane.b32.xlu1 %v4179_v4, %s5747_s29  ;;  %s5766_s29 = smov 16   ;;  %v4234_v4 = vpack.i.bf16 %v3051_v8, %v3026_v5  ;;  %v5371_v5 = vld [vmem:[#allocation2 + $0x30] sm:$0xff]  ;;  %v5419_v8 = vld [vmem:[#allocation2 + $0x60] sm:$0xff] }
 0x3c1   : > { %4175 = vrot.lane.b32.xlu0 %v4169_v16, %s5749_s30  ;;  %v3059_v16 = vld [vmem:[#allocation3 + $0x91] sm:$0xff] }
 0x3c2   : > { %v4239_v19 = vpack.i.bf16 %v3059_v16, %v3034_v21  ;;  %v4392_v21 = vld [vmem:[%s5729_s8] sm:$0xff]   ;;  %v5421_v16 = vld [vmem:[#allocation2 + $0x70] sm:$0xff] }
 0x3c3   : > { %v4314_v39 = vpack.i.bf16 %v5421_v16, %v5419_v8 }
 0x3c4   : > { %4185 = vrot.lane.b32.xlu1 %v4184_v30, %s4470_s0  ;;  %v4391_v30 = vld [vmem:[%s5729_s8 + $0x40] sm:$0xff]  }
 0x3c5   : > { %4190 = vrot.lane.b32.xlu0 %v4189_v3, %s5750_s22  ;;  %v5359_v3 = vld [vmem:[#allocation2 + $0x11] sm:$0xff]  ;;  %3817 = vmatprep.subr.bf16.mxu0 %v4391_v30 }
 0x3c6   : > { %v4249_v27 = vpack.i.bf16 %v5359_v3, %v2195_v12  ;;  %3818 = vmatpush3.bf16.msra.mxu0 %v4392_v21  ;;  %v2995_v21 = vld [vmem:[#allocation3] sm:$0xff] }
 0x3c8   : > { %4200 = vrot.lane.b32.xlu1 %v4199_v34, %s5750_s22  ;;  %v4254_v34 = vpack.i.bf16 %v5371_v5, %v5375_v33  ;;  %s4473_s22 = smov [#allocation4]  }
 0x3c9   : > { %4195 = vrot.lane.b32.xlu0 %v4194_v35, %s4470_s0  ;;  %v4259_v35 = vpack.i.bf16 %v2227_v23, %v2203_v11  ;;  %v4359_v23 = vpack.i.bf16 %v2242_v18, %v5421_v16  ;;  %s5672_s0 = scalar_lea.hbm %s5738_s17, %s3724_s19 }
 0x3cc   : > { %4210 = vrot.lane.b32.xlu1 %v4209_v37, %s4465_s26  ;;  %v5381_v37 = vld [vmem:[#allocation2 + $0x10] sm:$0xff] }
 0x3cd   : > { %4205 = vrot.lane.b32.xlu0 %v4204_v38, %s5765_s21  ;;  %v5385_v38 = vld [vmem:[#allocation2 + $0x21] sm:$0xff]  ;;  %v4269_v53 = vpack.i.bf16 %v5375_v33, %v5381_v37 }
 0x3ce   : > { %v4264_v48 = vpack.i.bf16 %v5379_v36, %v5385_v38 }
 0x3d0   : > { %4220 = vrot.lane.b32.xlu1 %v4214_v57, %s5766_s29 }
 0x3d1   : > { %4215 = vrot.lane.b32.xlu0 %v4214_v57, %s4472_s18  ;;  %v5400_v57 = vld [vmem:[#allocation2 + $0x40] sm:$0xff] }
 0x3d2   : > { %v4284_v62 = vpack.i.bf16 %v5393_v55, %v5400_v57  ;;  %v4299_v6 = vpack.i.bf16 %v5400_v57, %v5371_v5 }
 0x3d4   : > { %4225 = vrot.lane.b32.xlu1 %v4224_v2, %s5765_s21  ;;  %v5411_v2 = vld [vmem:[#allocation2 + $0x41] sm:$0xff] }
 0x3d5   : > { %4230 = vrot.lane.b32.xlu0 %v4229_v1, %s5767_s24  ;;  %v5404_v1 = vld [vmem:[#allocation2 + $0x51] sm:$0xff] }
 0x3d8   : > { %4240 = vrot.lane.b32.xlu1 %v4239_v19, %s4472_s18  ;;  %s5768_s18 = smov 64  }
 0x3d9   : > { %4235 = vrot.lane.b32.xlu0 %v4234_v4, %s4465_s26  ;;  %v2243_v4 = vld [vmem:[#allocation2 + $0x90] sm:$0xff] }
 0x3da   : > { %v4344_v41 = vpack.i.bf16 %v2243_v4, %v2242_v18 }
 0x3dc   : > { %4250 = vrot.lane.b32.xlu1 %v4249_v27, %s5767_s24 }
 0x3dd   : > { %4245 = vrot.lane.b32.xlu0 %v4244_v22, %s5767_s24 }
 0x3e0   : > { %4260 = vrot.lane.b32.xlu1 %v4259_v35, %s5768_s18 }
 0x3e1   : > { %4255 = vrot.lane.b32.xlu0 %v4254_v34, %s5768_s18 }
 0x3e4   : > { %4270 = vrot.lane.b32.xlu1 %v4269_v53, %s4465_s26 }
 0x3e5   : > { %4265 = vrot.lane.b32.xlu0 %v4264_v48, %s4465_s26 }
 0x3e8   : > { %4280 = vrot.lane.b32.xlu1 %v4264_v48, %s5767_s24 }
 0x3e9   : > { %4275 = vrot.lane.b32.xlu0 %v4274_v45, %s5767_s24  ;;  %v4294_v45 = vpack.i.bf16 %v5404_v1, %v5411_v2 }
 0x3ec   : > { %4290 = vrot.lane.b32.xlu1 %v4289_v49, %s5768_s18  ;;  %v5432_v49 = vld [vmem:[#allocation2 + $0x71] sm:$0xff] }
 0x3ed   : > { %4285 = vrot.lane.b32.xlu0 %v4284_v62, %s5768_s18  ;;  %v4324_v17 = vpack.i.bf16 %v5432_v49, %v5430_v40 }
 0x3f0   : > { %4300 = vrot.lane.b32.xlu1 %v4299_v6, %s4465_s26 }
 0x3f1   : > { %4295 = vrot.lane.b32.xlu0 %v4294_v45, %s4465_s26 }
 0x3f4   : > { %4310 = vrot.lane.b32.xlu1 %v4294_v45, %s5767_s24 }
 0x3f5   : > { %4305 = vrot.lane.b32.xlu0 %v4304_v54, %s5767_s24  ;;  %v4329_v54 = vpack.i.bf16 %v5419_v8, %v5393_v55 }
 0x3f8   : > { %4320 = vrot.lane.b32.xlu1 %v4319_v50, %s5768_s18  ;;  %v2251_v50 = vld [vmem:[#allocation2 + $0x91] sm:$0xff] }
 0x3f9   : > { %4315 = vrot.lane.b32.xlu0 %v4314_v39, %s5768_s18  ;;  %v4354_v19 = vpack.i.bf16 %v2251_v50, %v5450_v42 }
 0x3fc   : > { %4330 = vrot.lane.b32.xlu1 %v4329_v54, %s4465_s26 }
 0x3fd   : > { %4325 = vrot.lane.b32.xlu0 %v4324_v17, %s4465_s26 }
 0x400   : > { %4340 = vrot.lane.b32.xlu1 %v4324_v17, %s5767_s24 }
 0x401   : > { %4335 = vrot.lane.b32.xlu0 %v4334_v63, %s5767_s24 }
 0x404   : > { %4350 = vrot.lane.b32.xlu1 %v4349_v58, %s5768_s18 }
 0x405   : > { %4345 = vrot.lane.b32.xlu0 %v4344_v41, %s5768_s18  ;;  %s3666_s18 = sshll.u32 %s539_s20, 6 }
 0x408   : > { %4360 = vrot.lane.b32.xlu1 %v4359_v23, %s4465_s26 }
 0x409   : > { %4355 = vrot.lane.b32.xlu0 %v4354_v19, %s4465_s26  ;;  %s5640_s26 = scalar_lea.vmem [#allocation4], %s3666_s18  ;;  %s4405_s18 = sshll.u32 %s4473_s22, 4  ;;  %s4406_s18 = int_to_ptr.vmem [resolvable:$false] %s4405_s18 }
 0x40a   : > { %s3600_s29 = sshll.u32 %s5640_s26, 4  ;;  %s4407_s19 = scalar_lea.vmem %s4406_s18, 2048  ;;  %s5674_s29 = int_to_ptr.vmem [resolvable:$true] %s3600_s29 }
 0x40b   : > { %p4408_p0 = scmp.lt.s32.totalorder %s5674_s29, %s4406_s18 }
 0x416   : > { %v4111_v63 = vpop.permute.xlu1 %4110 }
 0x417   : > { %v4106_v60 = vpop.permute.xlu0 %4105  ;;  %v4113_v52 = vunpack.i.h.bf16 %v4111_v63  ;;  %v4112_v58 = vunpack.i.l.bf16 %v4111_v63 }
 0x418   : > { %v4108_v22 = vunpack.i.h.bf16 %v4106_v60  ;;  %v4107_v27 = vunpack.i.l.bf16 %v4106_v60 }
 0x41a   : > { %v5463_v30 = vpop.permute.xlu1 %4115  ;;  %v3292_v34 = vsel %vm2964_vm6, %v2995_v21, %v4107_v27  ;;  %v3293_v35 = vsel %vm2964_vm6, %v5251_v46, %v4108_v22 }
 0x41b   : > { %v5461_v12 = vpop.permute.xlu0 %4120  ;;  %v3301_v6 = vsel %vm2156_vm4, %v3293_v35, %v4113_v52  ;;  %v3300_v39 = vsel %vm2156_vm4, %v3292_v34, %v4112_v58 }
 0x41e   : > { %v5465_v51 = vpop.permute.xlu1 %4125 }
 0x41f   : > { %v4131_v11 = vpop.permute.xlu0 %4130 }
 0x420   : > { %v4133_v48 = vunpack.i.h.bf16 %v4131_v11  ;;  %v4132_v53 = vunpack.i.l.bf16 %v4131_v11 }
 0x422   : > { %v4136_v45 = vpop.permute.xlu1 %4135  ;;  %v3309_v18 = vsel %vm3308_vm8, %v3300_v39, %v4132_v53  ;;  %v3310_v4 = vsel %vm3308_vm8, %v3301_v6, %v4133_v48 }
 0x423   : > { %v4141_v62 = vpop.permute.xlu0 %4140  ;;  %v4138_v17 = vunpack.i.h.bf16 %v4136_v45  ;;  %v4137_v54 = vunpack.i.l.bf16 %v4136_v45 }
 0x424   : > { %v4143_v41 = vunpack.i.h.bf16 %v4141_v62  ;;  %v4142_v50 = vunpack.i.l.bf16 %v4141_v62 }
 0x425   : > { %v3317_v19 = vsel %vm556_vm1, %v3309_v18, %v4137_v54  ;;  %v3318_v46 = vsel %vm556_vm1, %v3310_v4, %v4138_v17  ;;  %v4123_v18 = vunpack.i.h.bf16 %v5461_v12  ;;  %v4122_v4 = vunpack.i.l.bf16 %v5461_v12 }
 0x426   : > { %v4146_v60 = vpop.permute.xlu1 %4145  ;;  %v3326_v11 = vsel %vm3325_vm9, %v3317_v19, %v4142_v50  ;;  %v3327_v52 = vsel %vm3325_vm9, %v3318_v46, %v4143_v41  ;;  %v4118_v41 = vunpack.i.h.bf16 %v5463_v30  ;;  %v4117_v19 = vunpack.i.l.bf16 %v5463_v30 }
 0x427   : > { %v4151_v23 = vpop.permute.xlu0 %4150  ;;  %v4148_v27 = vunpack.i.h.bf16 %v4146_v60  ;;  %v4147_v21 = vunpack.i.l.bf16 %v4146_v60  ;;  %v4128_v46 = vunpack.i.h.bf16 %v5465_v51 }
 0x428   : > { %v4153_v63 = vunpack.i.h.bf16 %v4151_v23  ;;  %v4152_v22 = vunpack.i.l.bf16 %v4151_v23 }
 0x429   : > { %v3334_v58 = vsel %vm2468_vm10, %v3326_v11, %v4147_v21  ;;  %v3335_v34 = vsel %vm2468_vm10, %v3327_v52, %v4148_v27  ;;  %v4127_v21 = vunpack.i.l.bf16 %v5465_v51 }
 0x42a   : > { %v3343_v35 = vsel %vm3342_vm11, %v3334_v58, %v4152_v22  ;;  %v3344_v48 = vsel %vm3342_vm11, %v3335_v34, %v4153_v63  ;;  %v4156_v62 = vpop.permute.xlu1 %4155 }
 0x42b   : > { %v4161_v53 = vpop.permute.xlu0 %4160  ;;  %v3351_v45 = vpack.c.bf16 %v3344_v48, %v3343_v35  ;;  %v4158_v17 = vunpack.i.h.bf16 %v4156_v62  ;;  %v4157_v54 = vunpack.i.l.bf16 %v4156_v62 }
 0x42c   : > { %v4163_v6 = vunpack.i.h.bf16 %v4161_v53  ;;  %v4162_v39 = vunpack.i.l.bf16 %v4161_v53 }
 0x42d   : > { %v3295_v50 = vsel %vm2964_vm6, %v5235_v31, %v4158_v17  ;;  %3476 = vmatmul.mubr.bf16.vlgmr.msra.gmra.mxu1 %v3351_v45  ;;  %v3294_v60 = vsel %vm2964_vm6, %v5246_v44, %v4157_v54 }
 0x42e   : > { %v3303_v23 = vsel %vm2156_vm4, %v3295_v50, %v4163_v6  ;;  %v4171_v22 = vpop.permute.xlu1 %4170  ;;  %3713 = vmatprep.mubr.msk.bf16.mxu1 %vm2964_vm6, %v3354_v56  ;;  %v3302_v12 = vsel %vm2156_vm4, %v3294_v60, %v4162_v39 }
 0x42f   : > { %v4166_v63 = vpop.permute.xlu0 %4165  ;;  %v3312_v31 = vsel %vm3308_vm8, %v3303_v23, %v4118_v41  ;;  %v3311_v11 = vsel %vm3308_vm8, %v3302_v12, %v4117_v19  ;;  %v4173_v56 = vunpack.i.h.bf16 %v4171_v22  ;;  %v4172_v34 = vunpack.i.l.bf16 %v4171_v22 }
 0x430   : > { %v4168_v27 = vunpack.i.h.bf16 %v4166_v63  ;;  %v4167_v30 = vunpack.i.l.bf16 %v4166_v63  ;;  %v3320_v52 = vsel %vm556_vm1, %v3312_v31, %v4123_v18  ;;  %v3319_v44 = vsel %vm556_vm1, %v3311_v11, %v4122_v4 }
 0x431   : > { %v3329_v58 = vsel %vm3325_vm9, %v3320_v52, %v4128_v46  ;;  %v3328_v43 = vsel %vm3325_vm9, %v3319_v44, %v4127_v21 }
 0x432   : > { %v3337_v47 = vsel %vm2468_vm10, %v3329_v58, %v4168_v27  ;;  %v4181_v48 = vpop.permute.xlu1 %4180  ;;  %v3336_v53 = vsel %vm2468_vm10, %v3328_v43, %v4167_v30 }
 0x433   : > { %v4176_v35 = vpop.permute.xlu0 %4175  ;;  %v3345_v51 = vsel %vm3342_vm11, %v3336_v53, %v4172_v34  ;;  %v3346_v62 = vsel %vm3342_vm11, %v3337_v47, %v4173_v56  ;;  %v4183_v18 = vunpack.i.h.bf16 %v4181_v48  ;;  %v4182_v4 = vunpack.i.l.bf16 %v4181_v48 }
 0x434   : > { %v4178_v45 = vunpack.i.h.bf16 %v4176_v35  ;;  %v4177_v6 = vunpack.i.l.bf16 %v4176_v35  ;;  %v3353_v39 = vpack.c.bf16 %v3346_v62, %v3345_v51  ;;  %v3067_v62 = vld [vmem:[#allocation3 + $0x92] sm:$0xff] }
 0x436   : > { %v4186_v54 = vpop.permute.xlu1 %4185  ;;  %3484 = vmatmul.mubr.bf16.gmra.mxu1 %v3353_v39  ;;  %v3296_v41 = vsel %vm2964_vm6, %v5230_v29, %v4177_v6  ;;  %v3297_v50 = vsel %vm2964_vm6, %v5278_v10, %v4178_v45 }
 0x437   : > { %v5508_v17 = vpop.permute.xlu0 %4190  ;;  %3714 = vmatprep.mubr.msk.bf16.mxu1 %vm2964_vm6, %v3356_v15  ;;  %v3305_v63 = vsel %vm2156_vm4, %v3297_v50, %v4183_v18  ;;  %v3304_v22 = vsel %vm2156_vm4, %v3296_v41, %v4182_v4 }
 0x43a   : > { %v4201_v46 = vpop.permute.xlu1 %4200 }
 0x43b   : > { %v4196_v19 = vpop.permute.xlu0 %4195  ;;  %v4203_v12 = vunpack.i.h.bf16 %v4201_v46  ;;  %v4202_v31 = vunpack.i.l.bf16 %v4201_v46  ;;  %v4188_v46 = vunpack.i.h.bf16 %v4186_v54 }
 0x43c   : > { %v4198_v23 = vunpack.i.h.bf16 %v4196_v19  ;;  %v4197_v60 = vunpack.i.l.bf16 %v4196_v19  ;;  %v3358_v19 = vpack.c.bf16 %v3067_v62, %v5337_v61 }
 0x43e   : > { %v3313_v59 = vsel %vm3308_vm8, %v3304_v22, %v4197_v60  ;;  %v3314_v0 = vsel %vm3308_vm8, %v3305_v63, %v4198_v23  ;;  %v4211_v27 = vpop.permute.xlu1 %4210  ;;  %v4187_v23 = vunpack.i.l.bf16 %v4186_v54  ;;  %v4193_v22 = vunpack.i.h.bf16 %v5508_v17 }
 0x43f   : > { %v4206_v15 = vpop.permute.xlu0 %4205  ;;  %v3321_v10 = vsel %vm556_vm1, %v3313_v59, %v4202_v31  ;;  %v3322_v21 = vsel %vm556_vm1, %v3314_v0, %v4203_v12  ;;  %v4213_v11 = vunpack.i.h.bf16 %v4211_v27  ;;  %v4212_v52 = vunpack.i.l.bf16 %v4211_v27 }
 0x440   : > { %v4208_v29 = vunpack.i.h.bf16 %v4206_v15  ;;  %v4207_v30 = vunpack.i.l.bf16 %v4206_v15  ;;  %v4192_v12 = vunpack.i.l.bf16 %v5508_v17 }
 0x442   : > { %v3330_v44 = vsel %vm3325_vm9, %v3321_v10, %v4207_v30  ;;  %v3331_v58 = vsel %vm3325_vm9, %v3322_v21, %v4208_v29  ;;  %v4221_v47 = vpop.permute.xlu1 %4220 }
 0x443   : > { %v4216_v43 = vpop.permute.xlu0 %4215  ;;  %v3338_v35 = vsel %vm2468_vm10, %v3330_v44, %v4212_v52  ;;  %v3339_v48 = vsel %vm2468_vm10, %v3331_v58, %v4213_v11  ;;  %v4223_v53 = vunpack.i.h.bf16 %v4221_v47  ;;  %v4222_v51 = vunpack.i.l.bf16 %v4221_v47 }
 0x444   : > { %v4218_v56 = vunpack.i.h.bf16 %v4216_v43  ;;  %v4217_v34 = vunpack.i.l.bf16 %v4216_v43 }
 0x445   : > { %v3299_v60 = vsel %vm2964_vm6, %v5296_v25, %v4223_v53  ;;  %v3298_v63 = vsel %vm2964_vm6, %v5305_v14, %v4222_v51 }
 0x446   : > { %v3347_v45 = vsel %vm3342_vm11, %v3338_v35, %v4217_v34  ;;  %v3348_v6 = vsel %vm3342_vm11, %v3339_v48, %v4218_v56  ;;  %v4226_v18 = vpop.permute.xlu1 %4225 }
 0x447   : > { %v4231_v39 = vpop.permute.xlu0 %4230  ;;  %v3355_v4 = vpack.c.bf16 %v3348_v6, %v3347_v45  ;;  %v4228_v0 = vunpack.i.h.bf16 %v4226_v18  ;;  %v4227_v25 = vunpack.i.l.bf16 %v4226_v18 }
 0x448   : > { %v4233_v41 = vunpack.i.h.bf16 %v4231_v39  ;;  %v4232_v50 = vunpack.i.l.bf16 %v4231_v39  ;;  %v2187_v39 = vld [vmem:[#allocation2] sm:$0xff] }
 0x449   : > { %3492 = vmatmul.mubr.bf16.gmra.mxu1 %v3355_v4 }
 0x44a   : > { %v3306_v31 = vsel %vm2156_vm4, %v3298_v63, %v4232_v50  ;;  %v3307_v59 = vsel %vm2156_vm4, %v3299_v60, %v4233_v41  ;;  %3715 = vmatprep.mubr.msk.bf16.mxu1 %vm2964_vm6, %v3358_v19  ;;  %v4241_v27 = vpop.permute.xlu1 %4240 }
 0x44b   : > { %v3315_v61 = vsel %vm3308_vm8, %v3306_v31, %v4187_v23  ;;  %v3316_v54 = vsel %vm3308_vm8, %v3307_v59, %v4188_v46  ;;  %v4236_v15 = vpop.permute.xlu0 %4235  ;;  %v4243_v11 = vunpack.i.h.bf16 %v4241_v27  ;;  %v4242_v52 = vunpack.i.l.bf16 %v4241_v27 }
 0x44c   : > { %v3323_v14 = vsel %vm556_vm1, %v3315_v61, %v4192_v12  ;;  %v3324_v29 = vsel %vm556_vm1, %v3316_v54, %v4193_v22  ;;  %v4238_v30 = vunpack.i.h.bf16 %v4236_v15  ;;  %v4237_v17 = vunpack.i.l.bf16 %v4236_v15 }
 0x44d   : > { %v3332_v10 = vsel %vm3325_vm9, %v3323_v14, %v4227_v25  ;;  %v3333_v21 = vsel %vm3325_vm9, %v3324_v29, %v4228_v0 }
 0x44e   : > { %v3340_v44 = vsel %vm2468_vm10, %v3332_v10, %v4237_v17  ;;  %v3341_v58 = vsel %vm2468_vm10, %v3333_v21, %v4238_v30  ;;  %v4251_v47 = vpop.permute.xlu1 %4250 }
 0x44f   : > { %v4246_v43 = vpop.permute.xlu0 %4245  ;;  %v3349_v56 = vsel %vm3342_vm11, %v3340_v44, %v4242_v52  ;;  %v3350_v34 = vsel %vm3342_vm11, %v3341_v58, %v4243_v11  ;;  %v4253_v51 = vunpack.i.h.bf16 %v4251_v47  ;;  %v4252_v62 = vunpack.i.l.bf16 %v4251_v47 }
 0x450   : > { %v3357_v35 = vpack.c.bf16 %v3350_v34, %v3349_v56  ;;  %v4248_v48 = vunpack.i.h.bf16 %v4246_v43  ;;  %v4247_v53 = vunpack.i.l.bf16 %v4246_v43 }
 0x451   : > { %v2453_v23 = vsel %vm2156_vm4, %v5381_v37, %v4253_v51  ;;  %v2452_v60 = vsel %vm2156_vm4, %v2187_v39, %v4252_v62 }
 0x452   : > { %3500 = vmatmul.mubr.bf16.gmra.mxu1 %v3357_v35  ;;  %v4261_v6 = vpop.permute.xlu1 %4260  ;;  %v2478_v19 = vsel %vm2156_vm4, %v5385_v38, %v4248_v48  ;;  %v2477_v46 = vsel %vm2156_vm4, %v5359_v3, %v4247_v53 }
 0x453   : > { %v4256_v45 = vpop.permute.xlu0 %4255  ;;  %v4263_v41 = vunpack.i.h.bf16 %v4261_v6  ;;  %v4262_v50 = vunpack.i.l.bf16 %v4261_v6 }
 0x454   : > { %v4258_v18 = vunpack.i.h.bf16 %v4256_v45  ;;  %v4257_v4 = vunpack.i.l.bf16 %v4256_v45 }
 0x455   : > { %v2460_v38 = vsel %vm556_vm1, %v2452_v60, %v4262_v50  ;;  %v2461_v25 = vsel %vm556_vm1, %v2453_v23, %v4263_v41 }
 0x456   : > { %v4271_v22 = vpop.permute.xlu1 %4270  ;;  %v2485_v54 = vsel %vm556_vm1, %v2477_v46, %v4257_v4  ;;  %v2486_v0 = vsel %vm556_vm1, %v2478_v19, %v4258_v18 }
 0x457   : > { %v4266_v63 = vpop.permute.xlu0 %4265  ;;  %v4273_v59 = vunpack.i.h.bf16 %v4271_v22  ;;  %v4272_v61 = vunpack.i.l.bf16 %v4271_v22 }
 0x458   : > { %v4268_v12 = vunpack.i.h.bf16 %v4266_v63  ;;  %v4267_v31 = vunpack.i.l.bf16 %v4266_v63 }
 0x459   : > { %v2469_v3 = vsel %vm2468_vm10, %v2460_v38, %v4272_v61  ;;  %v2470_v37 = vsel %vm2468_vm10, %v2461_v25, %v4273_v59 }
 0x45a   : > { %v2493_v15 = vsel %vm2468_vm10, %v2485_v54, %v4267_v31  ;;  %v2494_v27 = vsel %vm2468_vm10, %v2486_v0, %v4268_v12  ;;  %v2501_v14 = vpack.c.bf16 %v2470_v37, %v2469_v3  ;;  %v4281_v30 = vpop.permute.xlu1 %4280 }
 0x45b   : > { %v4276_v29 = vpop.permute.xlu0 %4275  ;;  %v2502_v17 = vpack.c.bf16 %v2494_v27, %v2493_v15  ;;  %v4283_v11 = vunpack.i.h.bf16 %v4281_v30  ;;  %v4282_v52 = vunpack.i.l.bf16 %v4281_v30 }
 0x45c   : > { %v4278_v10 = vunpack.i.h.bf16 %v4276_v29  ;;  %v4277_v21 = vunpack.i.l.bf16 %v4276_v29 }
 0x45d   : > { %2701 = vmatprep.mubr.bf16.mxu0 %v2502_v17  ;;  %v2455_v53 = vsel %vm2156_vm4, %v5371_v5, %v4283_v11  ;;  %v2454_v51 = vsel %vm2156_vm4, %v5375_v33, %v4282_v52 }
 0x45e   : > { %2702 = vmatmul.mubr.bf16.vlgmr.msra.gmra.mxu0 %v2501_v14  ;;  %v4291_v58 = vpop.permute.xlu1 %4290  ;;  %v2480_v35 = vsel %vm2156_vm4, %v5411_v2, %v4278_v10  ;;  %v2479_v48 = vsel %vm2156_vm4, %v5379_v36, %v4277_v21 }
 0x45f   : > { %v4286_v44 = vpop.permute.xlu0 %4285  ;;  %v4293_v56 = vunpack.i.h.bf16 %v4291_v58  ;;  %v4292_v34 = vunpack.i.l.bf16 %v4291_v58 }
 0x460   : > { %v4288_v43 = vunpack.i.h.bf16 %v4286_v44  ;;  %v4287_v47 = vunpack.i.l.bf16 %v4286_v44 }
 0x461   : > { %v2462_v2 = vsel %vm556_vm1, %v2454_v51, %v4292_v34  ;;  %v2463_v36 = vsel %vm556_vm1, %v2455_v53, %v4293_v56 }
 0x462   : > { %v4301_v45 = vpop.permute.xlu1 %4300  ;;  %v2487_v41 = vsel %vm556_vm1, %v2479_v48, %v4287_v47  ;;  %v2488_v50 = vsel %vm556_vm1, %v2480_v35, %v4288_v43 }
 0x463   : > { %v4296_v62 = vpop.permute.xlu0 %4295  ;;  %v4303_v18 = vunpack.i.h.bf16 %v4301_v45  ;;  %v4302_v4 = vunpack.i.l.bf16 %v4301_v45 }
 0x464   : > { %v4298_v6 = vunpack.i.h.bf16 %v4296_v62  ;;  %v4297_v39 = vunpack.i.l.bf16 %v4296_v62 }
 0x465   : > { %v2471_v33 = vsel %vm2468_vm10, %v2462_v2, %v4302_v4  ;;  %v2472_v46 = vsel %vm2468_vm10, %v2463_v36, %v4303_v18 }
 0x466   : > { %v2495_v19 = vsel %vm2468_vm10, %v2487_v41, %v4297_v39  ;;  %v2496_v5 = vsel %vm2468_vm10, %v2488_v50, %v4298_v6  ;;  %v4311_v60 = vpop.permute.xlu1 %4310  ;;  %v2504_v22 = vpack.c.bf16 %v2472_v46, %v2471_v33 }
 0x467   : > { %v4306_v23 = vpop.permute.xlu0 %4305  ;;  %v2505_v63 = vpack.c.bf16 %v2496_v5, %v2495_v19  ;;  %v4313_v59 = vunpack.i.h.bf16 %v4311_v60  ;;  %v4312_v61 = vunpack.i.l.bf16 %v4311_v60 }
 0x468   : > { %v4308_v12 = vunpack.i.h.bf16 %v4306_v23  ;;  %v4307_v31 = vunpack.i.l.bf16 %v4306_v23 }
 0x469   : > { %2709 = vmatprep.mubr.bf16.mxu0 %v2505_v63  ;;  %v2457_v14 = vsel %vm2156_vm4, %v5393_v55, %v4313_v59  ;;  %v2456_v29 = vsel %vm2156_vm4, %v5400_v57, %v4312_v61 }
 0x46a   : > { %2710 = vmatmul.mubr.bf16.gmra.mxu0 %v2504_v22  ;;  %v4321_v0 = vpop.permute.xlu1 %4320  ;;  %v2482_v15 = vsel %vm2156_vm4, %v5430_v40, %v4308_v12  ;;  %v2481_v27 = vsel %vm2156_vm4, %v5404_v1, %v4307_v31 }
 0x46b   : > { %v4316_v54 = vpop.permute.xlu0 %4315  ;;  %v4323_v3 = vunpack.i.h.bf16 %v4321_v0  ;;  %v4322_v37 = vunpack.i.l.bf16 %v4321_v0 }
 0x46c   : > { %v4318_v38 = vunpack.i.h.bf16 %v4316_v54  ;;  %v4317_v25 = vunpack.i.l.bf16 %v4316_v54 }
 0x46d   : > { %v2464_v40 = vsel %vm556_vm1, %v2456_v29, %v4322_v37  ;;  %v2465_v1 = vsel %vm556_vm1, %v2457_v14, %v4323_v3  ;;  %v3717_v3 = vld [vmem:[%s5737_s16] ss:$0 sm:$0xff] }
 0x46e   : > { %v4331_v17 = vpop.permute.xlu1 %4330  ;;  %v2489_v44 = vsel %vm556_vm1, %v2481_v27, %v4317_v25  ;;  %v2490_v58 = vsel %vm556_vm1, %v2482_v15, %v4318_v38  ;;  %v3716_v38 = vld [vmem:[%s5736_s15] ss:$0 sm:$0xff] }
 0x46f   : > { %v4326_v30 = vpop.permute.xlu0 %4325  ;;  %v4333_v11 = vunpack.i.h.bf16 %v4331_v17  ;;  %v4332_v52 = vunpack.i.l.bf16 %v4331_v17 }
 0x470   : > { %v4328_v10 = vunpack.i.h.bf16 %v4326_v30  ;;  %v4327_v21 = vunpack.i.l.bf16 %v4326_v30 }
 0x471   : > { %v2473_v57 = vsel %vm2468_vm10, %v2464_v40, %v4332_v52  ;;  %v2474_v47 = vsel %vm2468_vm10, %v2465_v1, %v4333_v11 }
 0x472   : > { %v2497_v43 = vsel %vm2468_vm10, %v2489_v44, %v4327_v21  ;;  %v2498_v55 = vsel %vm2468_vm10, %v2490_v58, %v4328_v10  ;;  %v4341_v34 = vpop.permute.xlu1 %4340  ;;  %v2507_v48 = vpack.c.bf16 %v2474_v47, %v2473_v57 }
 0x473   : > { %v4336_v56 = vpop.permute.xlu0 %4335  ;;  %v2508_v35 = vpack.c.bf16 %v2498_v55, %v2497_v43  ;;  %v4343_v62 = vunpack.i.h.bf16 %v4341_v34  ;;  %v4342_v45 = vunpack.i.l.bf16 %v4341_v34 }
 0x474   : > { %v4338_v53 = vunpack.i.h.bf16 %v4336_v56  ;;  %v4337_v51 = vunpack.i.l.bf16 %v4336_v56 }
 0x475   : > { %2717 = vmatprep.mubr.bf16.mxu0 %v2508_v35  ;;  %v2459_v19 = vsel %vm2156_vm4, %v5421_v16, %v4343_v62  ;;  %v2458_v5 = vsel %vm2156_vm4, %v5419_v8, %v4342_v45 }
 0x476   : > { %2718 = vmatmul.mubr.bf16.gmra.mxu0 %v2507_v48  ;;  %v4351_v39 = vpop.permute.xlu1 %4350  ;;  %v2484_v2 = vsel %vm2156_vm4, %v5450_v42, %v4338_v53  ;;  %v2483_v36 = vsel %vm2156_vm4, %v5432_v49, %v4337_v51 }
 0x477   : > { %v4346_v6 = vpop.permute.xlu0 %4345  ;;  %v4353_v41 = vunpack.i.h.bf16 %v4351_v39  ;;  %v4352_v50 = vunpack.i.l.bf16 %v4351_v39 }
 0x478   : > { %v4348_v18 = vunpack.i.h.bf16 %v4346_v6  ;;  %v4347_v4 = vunpack.i.l.bf16 %v4346_v6 }
 0x479   : > { %v2466_v42 = vsel %vm556_vm1, %v2458_v5, %v4352_v50  ;;  %v2467_v49 = vsel %vm556_vm1, %v2459_v19, %v4353_v41 }
 0x47a   : > { %v4361_v46 = vpop.permute.xlu1 %4360  ;;  %v2491_v12 = vsel %vm556_vm1, %v2483_v36, %v4347_v4  ;;  %v2492_v31 = vsel %vm556_vm1, %v2484_v2, %v4348_v18 }
 0x47b   : > { %v4356_v33 = vpop.permute.xlu0 %4355  ;;  %v4363_v63 = vunpack.i.h.bf16 %v4361_v46  ;;  %v4362_v22 = vunpack.i.l.bf16 %v4361_v46 }
 0x47c   : > { %v4358_v23 = vunpack.i.h.bf16 %v4356_v33  ;;  %v4357_v60 = vunpack.i.l.bf16 %v4356_v33 }
 0x47d   : > { %v2475_v8 = vsel %vm2468_vm10, %v2466_v42, %v4362_v22  ;;  %v2476_v61 = vsel %vm2468_vm10, %v2467_v49, %v4363_v63 }
 0x47e   : > { %v2499_v59 = vsel %vm2468_vm10, %v2491_v12, %v4357_v60  ;;  %v2500_v16 = vsel %vm2468_vm10, %v2492_v31, %v4358_v23  ;;  %v2510_v0 = vpack.c.bf16 %v2476_v61, %v2475_v8  ;;  %v3693_v60 = vld [vmem:[%s5730_s9] ss:$0 sm:$0xff] }
 0x47f   : > { %v2511_v54 = vpack.c.bf16 %v2500_v16, %v2499_v59  ;;  %v3694_v31 = vld [vmem:[%s5731_s10] ss:$0 sm:$0xff] }
 0x481   : > { %2725 = vmatprep.mubr.bf16.mxu0 %v2511_v54 }
 0x482   : > { %2726 = vmatmul.mubr.bf16.gmra.mxu0 %v2510_v0 }
 0x4ed   : > { %v3477_v25 = vpop.f32.mrf.mxu1 }
 0x4ee   : > { %v3515_v37 = vmul.f32 %v3716_v38, %v3477_v25 }
 0x4ef   : > { %v3479_v15 = vpop.f32.mrf.mxu1 }
 0x4f0   : > { %v3530_v27 = vadd.f32 %v3717_v3, %v3515_v37 }
 0x4f1   : > { %v3480_v14 = vpop.f32.mrf.mxu1 }
 0x4f2   : > { %v3516_v29 = vmul.f32 %v3716_v38, %v3480_v14  ;;  %3546 = vrot.lane.b32.xlu0 %v3530_v27, %s5767_s24 }
 0x4f3   : > { %v3482_v30 = vpop.f32.mrf.mxu1 }
 0x4f4   : > { %v3531_v17 = vadd.f32 %v3717_v3, %v3516_v29 }
 0x4f6   : > { %3548 = vrot.lane.b32.xlu1 %v3531_v17, %s5767_s24  ;;  %v3485_v10 = vpop.f32.mrf.mxu1 }
 0x4f7   : > { %v3517_v21 = vmul.f32 %v3716_v38, %v3485_v10 }
 0x4f8   : > { %v3487_v11 = vpop.f32.mrf.mxu1 }
 0x4f9   : > { %v3532_v52 = vadd.f32 %v3717_v3, %v3517_v21 }
 0x4fa   : > { %v3488_v44 = vpop.f32.mrf.mxu1 }
 0x4fb   : > { %v3518_v58 = vmul.f32 %v3716_v38, %v3488_v44  ;;  %3550 = vrot.lane.b32.xlu0 %v3532_v52, %s5767_s24 }
 0x4fc   : > { %v3490_v40 = vpop.f32.mrf.mxu1 }
 0x4fd   : > { %v3533_v1 = vadd.f32 %v3717_v3, %v3518_v58 }
 0x4ff   : > { %3552 = vrot.lane.b32.xlu1 %v3533_v1, %s5767_s24 }
 0x509   : > { %v3493_v43 = vpop.f32.mrf.mxu1 }
 0x50a   : > { %v3519_v55 = vmul.f32 %v3716_v38, %v3493_v43 }
 0x50b   : > { %v3495_v57 = vpop.f32.mrf.mxu1 }
 0x50c   : > { %v3534_v47 = vadd.f32 %v3717_v3, %v3519_v55 }
 0x50d   : > { %v3496_v56 = vpop.f32.mrf.mxu1 }
 0x50e   : > { %v3520_v34 = vmul.f32 %v3716_v38, %v3496_v56  ;;  %3554 = vrot.lane.b32.xlu0 %v3534_v47, %s5767_s24 }
 0x50f   : > { %v3498_v35 = vpop.f32.mrf.mxu1 }
 0x510   : > { %v3535_v48 = vadd.f32 %v3717_v3, %v3520_v34 }
 0x512   : > { %3556 = vrot.lane.b32.xlu1 %v3535_v48, %s5767_s24  ;;  %v3501_v53 = vpop.f32.mrf.mxu1 }
 0x513   : > { %v3521_v51 = vmul.f32 %v3716_v38, %v3501_v53 }
 0x514   : > { %v3503_v62 = vpop.f32.mrf.mxu1 }
 0x515   : > { %v3536_v45 = vadd.f32 %v3717_v3, %v3521_v51 }
 0x516   : > { %v3504_v6 = vpop.f32.mrf.mxu1 }
 0x517   : > { %v3522_v39 = vmul.f32 %v3716_v38, %v3504_v6  ;;  %3558 = vrot.lane.b32.xlu0 %v3536_v45, %s5767_s24 }
 0x518   : > { %v3506_v18 = vpop.f32.mrf.mxu1 }
 0x519   : > { %v3537_v4 = vadd.f32 %v3717_v3, %v3522_v39 }
 0x51b   : > { %3560 = vrot.lane.b32.xlu1 %v3537_v4, %s5767_s24  ;;  %s4401_s24 = scalar_lea.vmem %s5674_s29, 1024 }
 0x51c   : > { %p4402_p11 = scmp.ne.s32.totalorder %s5674_s29, %s4401_s24  ;;  %p4409_p1 = scmp.lt.s32.totalorder %s4407_s19, %s4401_s24 }
 0x51e   : > { %v3819_v41 = vpop.f32.mrf.mxu0  ;;  %p4403_p12 = pnand %p4402_p11, %p4604_p5  ;;  %p4410_p2 = por %p4409_p1, %p4408_p0 }
 0x520   : > { %v3820_v50 = vpop.f32.mrf.mxu0  ;;  %p4404_p13 = pneg %p4403_p12 }
 0x521   : > { %v3821_v5 = vadd.f32 %v3820_v50, %v3819_v41 }
 0x522   : > { %v3822_v2 = vpop.f32.mrf.mxu0  ;;  %p4411_p3 = pnand %p4410_p2, %p4404_p13 }
 0x523   : > { %v2769_v46 = vadd.f32 %v3821_v5, %v5176_v7 }
 0x524   : > { %v3823_v36 = vpop.f32.mrf.mxu0 }
 0x525   : > { %v3824_v23 = vadd.f32 %v3823_v36, %v3822_v2  ;;  %v2806_v22 = vmul.f32 %v3693_v60, %v2769_v46 }
 0x527   : > { %v2772_v12 = vadd.f32 %v3824_v23, %v5180_v32  ;;  %v2821_v16 = vadd.f32 %v3694_v31, %v2806_v22 }
 0x529   : > { %v2807_v59 = vmul.f32 %v3693_v60, %v2772_v12 }
 0x52a   : > { %v3825_v19 = vpop.f32.mrf.mxu0 }
 0x52b   : > { %v2822_v38 = vadd.f32 %v3694_v31, %v2807_v59 }
 0x52c   : > { %v3826_v33 = vpop.f32.mrf.mxu0 }
 0x52d   : > { %v3827_v42 = vadd.f32 %v3826_v33, %v3825_v19 }
 0x52e   : > { %v3828_v63 = vpop.f32.mrf.mxu0 }
 0x52f   : > { %v2777_v61 = vadd.f32 %v5174_v26, %v3827_v42 }
 0x530   : > { %v3829_v49 = vpop.f32.mrf.mxu0 }
 0x531   : > { %v3830_v54 = vadd.f32 %v3829_v49, %v3828_v63  ;;  %v2808_v3 = vmul.f32 %v3693_v60, %v2777_v61 }
 0x533   : > { %v2780_v37 = vadd.f32 %v5178_v28, %v3830_v54  ;;  %v2823_v14 = vadd.f32 %v3694_v31, %v2808_v3 }
 0x535   : > { %v2809_v27 = vmul.f32 %v3693_v60, %v2780_v37 }
 0x536   : > { %v3831_v7 = vpop.f32.mrf.mxu0 }
 0x537   : > { %v2824_v21 = vadd.f32 %v3694_v31, %v2809_v27 }
 0x538   : > { %v3832_v32 = vpop.f32.mrf.mxu0 }
 0x539   : > { %v3833_v11 = vadd.f32 %v3832_v32, %v3831_v7 }
 0x53a   : > { %v3834_v26 = vpop.f32.mrf.mxu0 }
 0x53b   : > { %v2785_v58 = vadd.f32 %v3833_v11, %v5191_v20 }
 0x53c   : > { %v3835_v30 = vpop.f32.mrf.mxu0 }
 0x53d   : > { %v3836_v40 = vadd.f32 %v3835_v30, %v3834_v26  ;;  %v2810_v43 = vmul.f32 %v3693_v60, %v2785_v58 }
 0x53f   : > { %v2788_v55 = vadd.f32 %v3836_v40, %v5199_v9  ;;  %v2825_v34 = vadd.f32 %v3694_v31, %v2810_v43 }
 0x541   : > { %v2811_v56 = vmul.f32 %v3693_v60, %v2788_v55 }
 0x542   : > { %v3837_v10 = vpop.f32.mrf.mxu0 }
 0x543   : > { %v2826_v20 = vadd.f32 %v3694_v31, %v2811_v56 }
 0x544   : > { %v3838_v28 = vpop.f32.mrf.mxu0 }
 0x545   : > { %v3839_v57 = vadd.f32 %v3838_v28, %v3837_v10 }
 0x546   : > { %v3840_v1 = vpop.f32.mrf.mxu0 }
 0x547   : > { %v2793_v48 = vadd.f32 %v5185_v13, %v3839_v57 }
 0x548   : > { %v3841_v47 = vpop.f32.mrf.mxu0 }
 0x549   : > { %v3842_v53 = vadd.f32 %v3841_v47, %v3840_v1  ;;  %v2812_v45 = vmul.f32 %v3693_v60, %v2793_v48 }
 0x54b   : > { %v2796_v9 = vadd.f32 %v5194_v24, %v3842_v53  ;;  %v2827_v13 = vadd.f32 %v3694_v31, %v2812_v45 }
 0x54d   : > { %v2813_v39 = vmul.f32 %v3693_v60, %v2796_v9 }
 0x54f   : > { %v2828_v41 = vadd.f32 %v3694_v31, %v2813_v39 }
 0x564   : > { %v3547_v8 = vpop.permute.xlu0 %3546 }
 0x565   : > { %v3570_v0 = vsel %vm2156_vm4, %v2821_v16, %v3547_v8 }
 0x566   : > { %3578 = vst.msk [vmem:[%s5640_s26] sm:$0xff] %vm3308_vm8, %v3570_v0 }
 0x568   : > { %v3549_v25 = vpop.permute.xlu1 %3548 }
 0x569   : > { %v3571_v15 = vsel %vm2156_vm4, %v2822_v38, %v3549_v25 }
 0x56a   : > { %3579 = vst.msk [vmem:[%s5640_s26 + $0x8] sm:$0xff] %vm3308_vm8, %v3571_v15 }
 0x56d   : > { %v3551_v29 = vpop.permute.xlu0 %3550 }
 0x56e   : > { %v3572_v17 = vsel %vm2156_vm4, %v2823_v14, %v3551_v29 }
 0x56f   : > { %3580 = vst.msk [vmem:[%s5640_s26 + $0x10] sm:$0xff] %vm3308_vm8, %v3572_v17 }
 0x571   : > { %v3553_v52 = vpop.permute.xlu1 %3552 }
 0x572   : > { %v3573_v44 = vsel %vm2156_vm4, %v2824_v21, %v3553_v52 }
 0x573   : > { %3581 = vst.msk [vmem:[%s5640_s26 + $0x18] sm:$0xff] %vm3308_vm8, %v3573_v44 }
 0x580   : > { %v3555_v35 = vpop.permute.xlu0 %3554 }
 0x581   : > { %v3574_v51 = vsel %vm2156_vm4, %v2825_v34, %v3555_v35 }
 0x582   : > { %3582 = vst.msk [vmem:[%s5640_s26 + $0x20] sm:$0xff] %vm3308_vm8, %v3574_v51 }
 0x584   : > { %v3557_v62 = vpop.permute.xlu1 %3556 }
 0x585   : > { %v3575_v6 = vsel %vm2156_vm4, %v2826_v20, %v3557_v62 }
 0x586   : > { %3583 = vst.msk [vmem:[%s5640_s26 + $0x28] sm:$0xff] %vm3308_vm8, %v3575_v6 }
 0x589   : > { %v3559_v18 = vpop.permute.xlu0 %3558 }
 0x58a   : > { %v3576_v4 = vsel %vm2156_vm4, %v2827_v13, %v3559_v18 }
 0x58b   : > { %3584 = vst.msk [vmem:[%s5640_s26 + $0x30] sm:$0xff] %vm3308_vm8, %v3576_v4 }
 0x58d   : > { %v3561_v24 = vpop.permute.xlu1 %3560 }
 0x58e   : > { %v3577_v50 = vsel %vm2156_vm4, %v2828_v41, %v3561_v24 }
 0x58f   : > { %3585 = vst.msk [vmem:[%s5640_s26 + $0x38] sm:$0xff] %vm3308_vm8, %v3577_v50 }
 0x590   : > { %4414 = shalt.err (!%p4411_p3)
}
 0x591   : > { %s4415_s20 = scalar_lea.hbm %s5672_s0, 1024  ;;  %s4419_s21 = scalar_lea.hbm %s5738_s17, 2048 }
 0x592   : > { %p4416_p4 = scmp.ne.s32.totalorder %s5672_s0, %s4415_s20  ;;  %p4420_p9 = scmp.lt.s32.totalorder %s5672_s0, %s5738_s17 }
 0x593   : > { %p4421_p10 = scmp.lt.s32.totalorder %s4419_s21, %s4415_s20 }
 0x594   : > { %p4417_p7 = pnand %p4416_p4, %p4604_p5 }
 0x595   : > { %p4422_p11 = por %p4421_p10, %p4420_p9 }
 0x596   : > { %p4418_p8 = pneg %p4417_p7 }
 0x598   : > { %p4423_p12 = pnand %p4422_p11, %p4418_p8 }
 0x59a   : > { %4426 = shalt.err (!%p4423_p12)
}
 0x59b   : > { %s4474_s24 = smov 128   ;;  %s4475_s18 = smov 8  }
 0x59c   : > { %4053 = dma.vmem_to_hbm [thread:$0]  (%p4604_p5), %s5674_s29, 1024, %s5672_s0, %s5681_s28, %s4474_s24, %s4474_s24, %s4475_s18  }
 0x59d PF: > { %s5769_s19 = sld [smem:[#allocation7_spill]]  ;;  %p4059_p13 = scmp.ge.s32.totalorder %s4461_s27, 2 }
 0x59f   : > { %p4056_p0 = pnand %p4059_p13, %p4608_p6 }
 0x5a1   : > { %p4057_p1 = pneg %p4056_p0 }
 0x5a3   : > { %s3615_s30 = sand.u32 1, %s5769_s19  }
 0x5a4   : > { %s3616_s2 = scalar_lea.sflag [#allocation5], %s3615_s30 }
 0x5a5   : > { %4444 = dma.done.wait (%p4057_p1), %s3616_s2, 1024  }
 0x5a6   : > { %4446 = vsyncadd (%p4057_p1), %s3616_s2, 4294966272  ;;  %s5771_s27 = sld [smem:[#allocation9_spill]]  ;;  %s5774_s24 = smov %s4453_s25 }
 0x5a7   : > { %s5772_s20 = sld [smem:[#allocation8_spill]] }
 0x5a8   : > { %s5773_s26 = sld [smem:[#allocation10_spill]] }
 0x5ac   : > { %p27_p2 = scmp.ge.s32.totalorder %s5771_s27, 4  }
 0x5ad   : > { %s5775_s25 = smov %s5772_s20 }
 0x5ae   :  { %29 = sbr.rel (!%p27_p2) target bundleno = 7 (0x7), region = 127 }
 0x5b3   :  { %3621 = vsyncpa [#allocation5], 1 }
 0x5b4   :  { %3623 = vsyncpa [#allocation5 + $0x1], 1 }

</bundles_post_ra>
